<compile_context>
chip_gen: v5e
topology: v5e:2x2
jax: 0.10.0
libtpu: 0.0.40
codegen_flags: <defaults>
</compile_context>

<pallas_src>
import functools
import numpy as np

import jax
import jax.numpy as jnp
from jax import lax
from jax.experimental import pallas as pl
from jax.experimental.pallas import tpu as pltpu

PAD = 0            # utils.PAD
LN_EPS = 1e-5      # nn.LayerNorm default
NEG_INF = -1e9     # finite "masked" value (avoids NaN on fully-masked rows)


# ------------------------------------------------------------------
# In-kernel helper math (pure functions on already-loaded values)
# ------------------------------------------------------------------

def _layer_norm_mask(y, gamma, beta, npm):
    # LayerNorm over the feature axis (biased variance, as torch), then
    # affine and non-pad gating.
    mu = jnp.mean(y, axis=-1, keepdims=True)
    var = jnp.mean(jnp.square(y - mu), axis=-1, keepdims=True)
    return ((y - mu) * lax.rsqrt(var + LN_EPS) * gamma + beta) * npm


def _attend(q, k, v, masked, n_head, d_k, d_v):
    """q:(Lq,H*dk) bf16 (already scaled), k:(Lk,H*dk) bf16, v:(Lk,H*dv) bf16,
    masked: broadcastable bool against (Lq,Lk).  Returns (Lq,H*dv) f32."""
    heads = []
    for h in range(n_head):                                         # static unroll
        qh = q[:, h * d_k:(h + 1) * d_k]                            # (Lq, dk)
        kh = k[:, h * d_k:(h + 1) * d_k]                            # (Lk, dk)
        vh = v[:, h * d_v:(h + 1) * d_v]                            # (Lk, dv)
        # Contract on the last dims of both operands (no explicit k.T).
        s = jnp.einsum('qd,kd->qk', qh, kh,
                       preferred_element_type=jnp.float32)          # (Lq, Lk)
        s = jnp.where(masked, jnp.float32(NEG_INF), s)
        m = jnp.max(s, axis=-1, keepdims=True)
        e = jnp.exp(s - m)
        l = jnp.sum(e, axis=-1, keepdims=True)                      # >= 1, never 0
        p = (e * pl.reciprocal(l, approx=True)).astype(jnp.bfloat16)
        heads.append(jnp.dot(p, vh, preferred_element_type=jnp.float32))
    return jnp.concatenate(heads, axis=-1)                          # (Lq, H*dv)


def _self_attn_block(x, seqk, npm, wqkv, bqkv, fw, fb, gamma, beta,
                     n_head, d_k, d_v, scale):
    """Masked self-attention. x:(Lq,D) f32, seqk:(1,Lq) int32 key ids."""
    Lq = x.shape[0]
    # Single fused Q|K|V projection.
    qkv = jnp.dot(x.astype(jnp.bfloat16), wqkv,
                  preferred_element_type=jnp.float32) + bqkv        # (Lq, H*(2dk+dv))
    nqk = n_head * d_k
    q = (qkv[:, :nqk] * scale).astype(jnp.bfloat16)                 # pre-scale q
    k = qkv[:, nqk:2 * nqk].astype(jnp.bfloat16)
    v = qkv[:, 2 * nqk:].astype(jnp.bfloat16)

    # key-pad OR causal (subsequent) mask, built in-kernel.
    key_pad = (seqk == PAD)                                         # (1, Lq) bool
    row = lax.broadcasted_iota(jnp.int32, (Lq, Lq), 0)
    col = lax.broadcasted_iota(jnp.int32, (Lq, Lq), 1)
    masked = jnp.logical_or(key_pad, col > row)                     # (Lq, Lq)

    attn = _attend(q, k, v, masked, n_head, d_k, d_v)
    out = jnp.dot(attn.astype(jnp.bfloat16), fw,
                  preferred_element_type=jnp.float32) + fb          # (Lq, D)
    # TODO(synk): dropout omitted (inference semantics -> identity)
    return _layer_norm_mask(out + x, gamma, beta, npm)


def _cross_attn_block(xq, enc, seqk, npm, wq, bq, wkv, bkv, fw, fb, gamma, beta,
                      n_head, d_k, d_v, scale):
    """Encoder-decoder attention. xq:(Lq,D) f32, enc:(Ls,D) bf16,
    seqk:(1,Ls) int32 source key ids."""
    q = jnp.dot(xq.astype(jnp.bfloat16), wq,
                preferred_element_type=jnp.float32) + bq            # (Lq, H*dk)
    kv = jnp.dot(enc, wkv,
                 preferred_element_type=jnp.float32) + bkv          # (Ls, H*(dk+dv))
    q = (q * scale).astype(jnp.bfloat16)
    k = kv[:, :n_head * d_k].astype(jnp.bfloat16)
    v = kv[:, n_head * d_k:].astype(jnp.bfloat16)

    masked = (seqk == PAD)                                          # (1, Ls), broadcasts

    attn = _attend(q, k, v, masked, n_head, d_k, d_v)
    out = jnp.dot(attn.astype(jnp.bfloat16), fw,
                  preferred_element_type=jnp.float32) + fb          # (Lq, D)
    # TODO(synk): dropout omitted (inference semantics -> identity)
    return _layer_norm_mask(out + xq, gamma, beta, npm)


def _ffn_block(x, npm, w1, b1, w2, b2, gamma, beta):
    # Conv1d(kernel=1) == dense over the feature axis.
    h = jnp.maximum(
        jnp.dot(x.astype(jnp.bfloat16), w1,
                preferred_element_type=jnp.float32) + b1, 0.0)
    out = jnp.dot(h.astype(jnp.bfloat16), w2,
                  preferred_element_type=jnp.float32) + b2
    # TODO(synk): dropout omitted (inference semantics -> identity)
    return _layer_norm_mask(out + x, gamma, beta, npm)


# ------------------------------------------------------------------
# Fused decoder-layer kernel (one pallas_call per layer, grid over batch)
# ------------------------------------------------------------------

def _decoder_layer_kernel(*refs, n_head, d_k, d_v, scale):
    (x_ref, enc_ref, seqt_ref, seqs_ref, npm_ref,
     s_wqkv, s_bqkv, s_fw, s_fb, s_g, s_b,
     e_wq, e_bq, e_wkv, e_bkv, e_fw, e_fb, e_g, e_b,
     f_w1, f_b1, f_w2, f_b2, f_g, f_b,
     o_ref) = refs

    x = x_ref[...]                       # (Lq, D) f32  — residual stream in VMEM
    enc = enc_ref[0]                     # (Ls, D) bf16 — MXU operand only
    npm = npm_ref[...]                   # (Lq, 1) f32

    # masked self-attention (fused QKV)
    x = _self_attn_block(x, seqt_ref[0], npm,
                         s_wqkv[...], s_bqkv[...], s_fw[...], s_fb[...],
                         s_g[...], s_b[...],
                         n_head, d_k, d_v, scale)
    # encoder-decoder attention (Q + fused KV)
    x = _cross_attn_block(x, enc, seqs_ref[0], npm,
                          e_wq[...], e_bq[...], e_wkv[...], e_bkv[...],
                          e_fw[...], e_fb[...], e_g[...], e_b[...],
                          n_head, d_k, d_v, scale)
    # position-wise FFN
    x = _ffn_block(x, npm,
                   f_w1[...], f_b1[...], f_w2[...], f_b2[...],
                   f_g[...], f_b[...])

    o_ref[...] = x


def decoder_layer(x2d, enc3, seqt3, seqs3, npm, layer_params, *,
                  B, Lq, Ls, d_model, n_head, d_k, d_v):
    scale = 1.0 / float(np.sqrt(d_k))
    kern = functools.partial(_decoder_layer_kernel,
                             n_head=n_head, d_k=d_k, d_v=d_v, scale=scale)
    data_specs = [
        pl.BlockSpec((Lq, d_model), lambda b: (b, 0)),         # x (query / residual)
        pl.BlockSpec((1, Ls, d_model), lambda b: (b, 0, 0)),   # enc_output (bf16)
        pl.BlockSpec((1, 1, Lq), lambda b: (b, 0, 0)),         # tgt token ids (self keys)
        pl.BlockSpec((1, 1, Ls), lambda b: (b, 0, 0)),         # src token ids (cross keys)
        pl.BlockSpec((Lq, 1), lambda b: (b, 0)),               # non-pad gate column
    ]
    # All layer parameters are 2D; constant block index -> fetched once, stays in VMEM.
    w_specs = [pl.BlockSpec(w.shape, lambda b: (0, 0)) for w in layer_params]

    return pl.pallas_call(
        kern,
        grid=(B,),
        in_specs=data_specs + w_specs,
        out_specs=pl.BlockSpec((Lq, d_model), lambda b: (b, 0)),
        out_shape=jax.ShapeDtypeStruct((B * Lq, d_model), jnp.float32),
        compiler_params=pltpu.CompilerParams(
            dimension_semantics=("parallel",)),
    )(x2d, enc3, seqt3, seqs3, npm, *layer_params)


# ------------------------------------------------------------------
# Model glue (embedding gathers / parameter setup stay in plain JAX)
# ------------------------------------------------------------------

def get_absolute_position_table(n_position, d_hid, padding_idx=None):
    pos = np.arange(n_position, dtype=np.float64)[:, None]
    idx = np.arange(d_hid, dtype=np.float64)[None, :]
    angle = pos / np.power(10000.0, 2.0 * (idx // 2) / d_hid)
    table = np.zeros((n_position, d_hid), dtype=np.float64)
    table[:, 0::2] = np.sin(angle[:, 0::2])
    table[:, 1::2] = np.cos(angle[:, 1::2])
    if padding_idx is not None:
        table[padding_idx] = 0.0
    return jnp.asarray(table, dtype=jnp.float32)


def init_params(key, n_tgt_vocab, len_max_seq, d_word_vec, n_layers,
                n_head, d_k, d_v, d_model, d_inner):
    keys = iter(jax.random.split(key, 512))

    def nrm(shape, scale=0.05, dtype=jnp.float32):
        return (scale * jax.random.normal(next(keys), shape,
                                          dtype=jnp.float32)).astype(dtype)

    word_emb = nrm((n_tgt_vocab, d_word_vec), 1.0)
    word_emb = word_emb.at[PAD].set(0.0)                    # padding_idx
    pos_table = get_absolute_position_table(len_max_seq + 1, d_word_vec,
                                            padding_idx=0)

    def make_proj_parts():
        wq = nrm((d_model, n_head * d_k), dtype=jnp.bfloat16)
        bq = nrm((1, n_head * d_k))
        wk = nrm((d_model, n_head * d_k), dtype=jnp.bfloat16)
        bk = nrm((1, n_head * d_k))
        wv = nrm((d_model, n_head * d_v), dtype=jnp.bfloat16)
        bv = nrm((1, n_head * d_v))
        fc_w = nrm((n_head * d_v, d_model), dtype=jnp.bfloat16)
        fc_b = nrm((1, d_model))
        ln_g = jnp.ones((1, d_model), jnp.float32)
        ln_b = jnp.zeros((1, d_model), jnp.float32)
        return wq, bq, wk, bk, wv, bv, fc_w, fc_b, ln_g, ln_b

    def make_self_attn():
        wq, bq, wk, bk, wv, bv, fc_w, fc_b, ln_g, ln_b = make_proj_parts()
        return dict(
            wqkv=jnp.concatenate([wq, wk, wv], axis=1),     # fused Q|K|V
            bqkv=jnp.concatenate([bq, bk, bv], axis=1),
            fc_w=fc_w, fc_b=fc_b, ln_g=ln_g, ln_b=ln_b)

    def make_cross_attn():
        wq, bq, wk, bk, wv, bv, fc_w, fc_b, ln_g, ln_b = make_proj_parts()
        return dict(
            wq=wq, bq=bq,
            wkv=jnp.concatenate([wk, wv], axis=1),          # fused K|V
            bkv=jnp.concatenate([bk, bv], axis=1),
            fc_w=fc_w, fc_b=fc_b, ln_g=ln_g, ln_b=ln_b)

    layers = []
    for _ in range(n_layers):
        layers.append(dict(
            slf_attn=make_self_attn(),
            enc_attn=make_cross_attn(),
            ffn=dict(
                w1=nrm((d_model, d_inner), dtype=jnp.bfloat16), b1=nrm((1, d_inner)),
                w2=nrm((d_inner, d_model), dtype=jnp.bfloat16), b2=nrm((1, d_model)),
                ln_g=jnp.ones((1, d_model), jnp.float32),
                ln_b=jnp.zeros((1, d_model), jnp.float32),
            ),
        ))
    return dict(word_emb=word_emb, pos_table=pos_table, layers=layers)


def _flatten_layer_params(lyr):
    s, e, f = lyr["slf_attn"], lyr["enc_attn"], lyr["ffn"]
    return [s["wqkv"], s["bqkv"], s["fc_w"], s["fc_b"], s["ln_g"], s["ln_b"],
            e["wq"], e["bq"], e["wkv"], e["bkv"], e["fc_w"], e["fc_b"], e["ln_g"], e["ln_b"],
            f["w1"], f["b1"], f["w2"], f["b2"], f["ln_g"], f["ln_b"]]


def decoder_forward(params, tgt_seq, tgt_pos, src_seq, enc_output, *,
                    n_head, d_k, d_v):
    B, Lq = tgt_seq.shape
    Ls = src_seq.shape[1]
    d_model = params["word_emb"].shape[1]

    # Small per-sequence tensors computed once; masks themselves are built in-kernel.
    npm = (tgt_seq != PAD).astype(jnp.float32).reshape(B * Lq, 1)
    seqt3 = tgt_seq.astype(jnp.int32).reshape(B, 1, Lq)
    seqs3 = src_seq.astype(jnp.int32).reshape(B, 1, Ls)

    # Embedding + positional lookup (gather glue in plain JAX).
    x = (params["word_emb"][tgt_seq] + params["pos_table"][tgt_pos]).astype(jnp.float32)
    x = x.reshape(B * Lq, d_model)
    # Encoder output is only ever an MXU operand -> ship it to the kernel in bf16.
    enc3 = enc_output.astype(jnp.bfloat16)                  # (B, Ls, D)

    for lyr in params["layers"]:
        x = decoder_layer(x, enc3, seqt3, seqs3, npm, _flatten_layer_params(lyr),
                          B=B, Lq=Lq, Ls=Ls, d_model=d_model,
                          n_head=n_head, d_k=d_k, d_v=d_v)

    return x.reshape(B, Lq, d_model)


# ------------------------------------------------------------------
# Main
# ------------------------------------------------------------------

if __name__ == "__main__":
    # Small, decoder-consistent shapes
    n_tgt_vocab = 50
    len_max_seq = 16
    d_word_vec = d_model = 32
    n_layers = 2
    n_head = 4
    d_k = d_v = 8
    d_inner = 64
    B = 2
    Lq = 8      # target sequence length
    Ls = 8      # source sequence length

    root = jax.random.PRNGKey(0)
    k_par, k_tgt, k_src, k_enc = jax.random.split(root, 4)

    params = init_params(k_par, n_tgt_vocab, len_max_seq, d_word_vec,
                         n_layers, n_head, d_k, d_v, d_model, d_inner)

    # target / source token ids in [1, vocab); pad the tail of batch element 1
    tgt_seq = jax.random.randint(k_tgt, (B, Lq), 1, n_tgt_vocab, dtype=jnp.int32)
    tgt_seq = tgt_seq.at[1, 6:].set(PAD)
    tgt_pos = jnp.broadcast_to(jnp.arange(1, Lq + 1, dtype=jnp.int32)[None], (B, Lq))
    tgt_pos = jnp.where(tgt_seq != PAD, tgt_pos, 0)

    src_seq = jax.random.randint(k_src, (B, Ls), 1, n_tgt_vocab, dtype=jnp.int32)
    src_seq = src_seq.at[0, 7:].set(PAD)
    enc_output = jax.random.normal(k_enc, (B, Ls, d_model), dtype=jnp.float32)

    dec_out = decoder_forward(params, tgt_seq, tgt_pos, src_seq, enc_output,
                              n_head=n_head, d_k=d_k, d_v=d_v)
    dec_out = jax.block_until_ready(dec_out)

    assert dec_out.shape == (B, Lq, d_model)
    assert bool(jnp.all(jnp.isfinite(dec_out)))
    print("KERNEL_OK")
</pallas_src>

<mosaic_0001>
module attributes {stable_mosaic.version = 11 : i64} {
  func.func @_decoder_layer_kernel(%arg0: i32, %arg1: memref<8x32xf32, #tpu.memory_space<vmem>>, %arg2: memref<1x8x32xbf16, #tpu.memory_space<vmem>>, %arg3: memref<1x1x8xi32, #tpu.memory_space<vmem>>, %arg4: memref<1x1x8xi32, #tpu.memory_space<vmem>>, %arg5: memref<8x1xf32, #tpu.memory_space<vmem>>, %arg6: memref<32x96xbf16, #tpu.memory_space<vmem>>, %arg7: memref<1x96xf32, #tpu.memory_space<vmem>>, %arg8: memref<32x32xbf16, #tpu.memory_space<vmem>>, %arg9: memref<1x32xf32, #tpu.memory_space<vmem>>, %arg10: memref<1x32xf32, #tpu.memory_space<vmem>>, %arg11: memref<1x32xf32, #tpu.memory_space<vmem>>, %arg12: memref<32x32xbf16, #tpu.memory_space<vmem>>, %arg13: memref<1x32xf32, #tpu.memory_space<vmem>>, %arg14: memref<32x64xbf16, #tpu.memory_space<vmem>>, %arg15: memref<1x64xf32, #tpu.memory_space<vmem>>, %arg16: memref<32x32xbf16, #tpu.memory_space<vmem>>, %arg17: memref<1x32xf32, #tpu.memory_space<vmem>>, %arg18: memref<1x32xf32, #tpu.memory_space<vmem>>, %arg19: memref<1x32xf32, #tpu.memory_space<vmem>>, %arg20: memref<32x64xbf16, #tpu.memory_space<vmem>>, %arg21: memref<1x64xf32, #tpu.memory_space<vmem>>, %arg22: memref<64x32xbf16, #tpu.memory_space<vmem>>, %arg23: memref<1x32xf32, #tpu.memory_space<vmem>>, %arg24: memref<1x32xf32, #tpu.memory_space<vmem>>, %arg25: memref<1x32xf32, #tpu.memory_space<vmem>>, %arg26: memref<8x32xf32, #tpu.memory_space<vmem>>) attributes {dimension_semantics = [#tpu.dimension_semantics<parallel>], iteration_bounds = array<i64: 2>, scalar_prefetch = 0 : i64, scratch_operands = 0 : i64, tpu.core_type = #tpu.core_type<tc>, window_params = [{transform_indices = @transform_0, window_bounds = array<i64: 8, 32>}, {transform_indices = @transform_1, window_bounds = array<i64: 1, 8, 32>}, {transform_indices = @transform_2, window_bounds = array<i64: 1, 1, 8>}, {transform_indices = @transform_3, window_bounds = array<i64: 1, 1, 8>}, {transform_indices = @transform_4, window_bounds = array<i64: 8, 1>}, {pipeline_mode = #tpu.pipeline_mode<synchronous>, transform_indices = @transform_5, window_bounds = array<i64: 32, 96>}, {pipeline_mode = #tpu.pipeline_mode<synchronous>, transform_indices = @transform_6, window_bounds = array<i64: 1, 96>}, {pipeline_mode = #tpu.pipeline_mode<synchronous>, transform_indices = @transform_7, window_bounds = array<i64: 32, 32>}, {pipeline_mode = #tpu.pipeline_mode<synchronous>, transform_indices = @transform_8, window_bounds = array<i64: 1, 32>}, {pipeline_mode = #tpu.pipeline_mode<synchronous>, transform_indices = @transform_9, window_bounds = array<i64: 1, 32>}, {pipeline_mode = #tpu.pipeline_mode<synchronous>, transform_indices = @transform_10, window_bounds = array<i64: 1, 32>}, {pipeline_mode = #tpu.pipeline_mode<synchronous>, transform_indices = @transform_11, window_bounds = array<i64: 32, 32>}, {pipeline_mode = #tpu.pipeline_mode<synchronous>, transform_indices = @transform_12, window_bounds = array<i64: 1, 32>}, {pipeline_mode = #tpu.pipeline_mode<synchronous>, transform_indices = @transform_13, window_bounds = array<i64: 32, 64>}, {pipeline_mode = #tpu.pipeline_mode<synchronous>, transform_indices = @transform_14, window_bounds = array<i64: 1, 64>}, {pipeline_mode = #tpu.pipeline_mode<synchronous>, transform_indices = @transform_15, window_bounds = array<i64: 32, 32>}, {pipeline_mode = #tpu.pipeline_mode<synchronous>, transform_indices = @transform_16, window_bounds = array<i64: 1, 32>}, {pipeline_mode = #tpu.pipeline_mode<synchronous>, transform_indices = @transform_17, window_bounds = array<i64: 1, 32>}, {pipeline_mode = #tpu.pipeline_mode<synchronous>, transform_indices = @transform_18, window_bounds = array<i64: 1, 32>}, {pipeline_mode = #tpu.pipeline_mode<synchronous>, transform_indices = @transform_19, window_bounds = array<i64: 32, 64>}, {pipeline_mode = #tpu.pipeline_mode<synchronous>, transform_indices = @transform_20, window_bounds = array<i64: 1, 64>}, {pipeline_mode = #tpu.pipeline_mode<synchronous>, transform_indices = @transform_21, window_bounds = array<i64: 64, 32>}, {pipeline_mode = #tpu.pipeline_mode<synchronous>, transform_indices = @transform_22, window_bounds = array<i64: 1, 32>}, {pipeline_mode = #tpu.pipeline_mode<synchronous>, transform_indices = @transform_23, window_bounds = array<i64: 1, 32>}, {pipeline_mode = #tpu.pipeline_mode<synchronous>, transform_indices = @transform_24, window_bounds = array<i64: 1, 32>}, {transform_indices = @transform_25, window_bounds = array<i64: 8, 32>}]} {
    %c0 = arith.constant 0 : index
    %c0_0 = arith.constant 0 : index
    %0 = vector.load %arg1[%c0, %c0_0] : memref<8x32xf32, #tpu.memory_space<vmem>>, vector<8x32xf32>
    %c0_1 = arith.constant 0 : index
    %c0_2 = arith.constant 0 : index
    %c0_3 = arith.constant 0 : index
    %1 = vector.load %arg2[%c0_1, %c0_2, %c0_3] : memref<1x8x32xbf16, #tpu.memory_space<vmem>>, vector<1x8x32xbf16>
    %2 = vector.shape_cast %1 : vector<1x8x32xbf16> to vector<8x32xbf16>
    %c0_4 = arith.constant 0 : index
    %c0_5 = arith.constant 0 : index
    %3 = vector.load %arg5[%c0_4, %c0_5] : memref<8x1xf32, #tpu.memory_space<vmem>>, vector<8x1xf32>
    %c0_6 = arith.constant 0 : index
    %c0_7 = arith.constant 0 : index
    %c0_8 = arith.constant 0 : index
    %4 = vector.load %arg3[%c0_6, %c0_7, %c0_8] : memref<1x1x8xi32, #tpu.memory_space<vmem>>, vector<1x1x8xi32>
    %5 = vector.shape_cast %4 : vector<1x1x8xi32> to vector<1x8xi32>
    %c0_9 = arith.constant 0 : index
    %c0_10 = arith.constant 0 : index
    %6 = vector.load %arg6[%c0_9, %c0_10] : memref<32x96xbf16, #tpu.memory_space<vmem>>, vector<32x96xbf16>
    %c0_11 = arith.constant 0 : index
    %c0_12 = arith.constant 0 : index
    %7 = vector.load %arg7[%c0_11, %c0_12] : memref<1x96xf32, #tpu.memory_space<vmem>>, vector<1x96xf32>
    %c0_13 = arith.constant 0 : index
    %c0_14 = arith.constant 0 : index
    %8 = vector.load %arg8[%c0_13, %c0_14] : memref<32x32xbf16, #tpu.memory_space<vmem>>, vector<32x32xbf16>
    %c0_15 = arith.constant 0 : index
    %c0_16 = arith.constant 0 : index
    %9 = vector.load %arg9[%c0_15, %c0_16] : memref<1x32xf32, #tpu.memory_space<vmem>>, vector<1x32xf32>
    %c0_17 = arith.constant 0 : index
    %c0_18 = arith.constant 0 : index
    %10 = vector.load %arg10[%c0_17, %c0_18] : memref<1x32xf32, #tpu.memory_space<vmem>>, vector<1x32xf32>
    %c0_19 = arith.constant 0 : index
    %c0_20 = arith.constant 0 : index
    %11 = vector.load %arg11[%c0_19, %c0_20] : memref<1x32xf32, #tpu.memory_space<vmem>>, vector<1x32xf32>
    %12 = arith.truncf %0 : vector<8x32xf32> to vector<8x32xbf16>
    %cst = arith.constant dense<0.000000e+00> : vector<8x96xf32>
    %13 = tpu.matmul %12, %6, %cst {dimension_numbers = #tpu.dot_dimension_numbers<[1], [0], [0], [1], [0, 0, 1, 1], [], []>} : vector<8x32xbf16>, vector<32x96xbf16>, vector<8x96xf32> -> vector<8x96xf32>
    %14 = vector.broadcast %7 : vector<1x96xf32> to vector<8x96xf32>
    %15 = arith.addf %13, %14 : vector<8x96xf32>
    %16 = vector.extract_strided_slice %15 {offsets = [0, 0], sizes = [8, 32], strides = [1, 1]} : vector<8x96xf32> to vector<8x32xf32>
    %cst_21 = arith.constant 0.353553385 : f32
    %17 = vector.broadcast %cst_21 : f32 to vector<8x32xf32>
    %18 = arith.mulf %16, %17 : vector<8x32xf32>
    %19 = arith.truncf %18 : vector<8x32xf32> to vector<8x32xbf16>
    %20 = vector.extract_strided_slice %15 {offsets = [0, 32], sizes = [8, 32], strides = [1, 1]} : vector<8x96xf32> to vector<8x32xf32>
    %21 = arith.truncf %20 : vector<8x32xf32> to vector<8x32xbf16>
    %22 = vector.extract_strided_slice %15 {offsets = [0, 64], sizes = [8, 32], strides = [1, 1]} : vector<8x96xf32> to vector<8x32xf32>
    %23 = arith.truncf %22 : vector<8x32xf32> to vector<8x32xbf16>
    %c0_i32 = arith.constant 0 : i32
    %24 = vector.broadcast %c0_i32 : i32 to vector<1x8xi32>
    %25 = arith.cmpi eq, %5, %24 : vector<1x8xi32>
    %26 = tpu.iota {dimensions = array<i32: 0>} : vector<8x8xi32>
    %27 = tpu.iota {dimensions = array<i32: 1>} : vector<8x8xi32>
    %28 = arith.cmpi sgt, %27, %26 : vector<8x8xi32>
    %29 = vector.broadcast %25 : vector<1x8xi1> to vector<8x8xi1>
    %30 = arith.ori %29, %28 : vector<8x8xi1>
    %31 = vector.extract_strided_slice %19 {offsets = [0, 0], sizes = [8, 8], strides = [1, 1]} : vector<8x32xbf16> to vector<8x8xbf16>
    %32 = vector.extract_strided_slice %21 {offsets = [0, 0], sizes = [8, 8], strides = [1, 1]} : vector<8x32xbf16> to vector<8x8xbf16>
    %33 = vector.extract_strided_slice %23 {offsets = [0, 0], sizes = [8, 8], strides = [1, 1]} : vector<8x32xbf16> to vector<8x8xbf16>
    "tpu.trace_start"() <{level = 10 : i32, message = "qd,kd->qk"}> : () -> ()
    %cst_22 = arith.constant dense<0.000000e+00> : vector<8x8xf32>
    %34 = tpu.matmul %31, %32, %cst_22 {dimension_numbers = #tpu.dot_dimension_numbers<[1], [1], [0], [0], [0, 0, 1, 0], [], []>} : vector<8x8xbf16>, vector<8x8xbf16>, vector<8x8xf32> -> vector<8x8xf32>
    %cst_23 = arith.constant -1.000000e+09 : f32
    "tpu.trace_stop"() : () -> ()
    %35 = vector.broadcast %cst_23 : f32 to vector<8x8xf32>
    %36 = arith.select %30, %35, %34 : vector<8x8xi1>, vector<8x8xf32>
    %cst_24 = arith.constant dense<0xFF800000> : vector<8xf32>
    %37 = vector.multi_reduction <maximumf>, %36, %cst_24 [1] : vector<8x8xf32> to vector<8xf32>
    %38 = vector.shape_cast %37 : vector<8xf32> to vector<8x1xf32>
    %39 = vector.broadcast %38 : vector<8x1xf32> to vector<8x8xf32>
    %40 = arith.subf %36, %39 : vector<8x8xf32>
    %41 = math.exp %40 : vector<8x8xf32>
    %cst_25 = arith.constant dense<0.000000e+00> : vector<8xf32>
    %42 = vector.multi_reduction <add>, %41, %cst_25 [1] : vector<8x8xf32> to vector<8xf32>
    %43 = vector.shape_cast %42 : vector<8xf32> to vector<8x1xf32>
    %44 = tpu.reciprocal %43 {approx = true} : vector<8x1xf32> -> vector<8x1xf32>
    %45 = vector.broadcast %44 : vector<8x1xf32> to vector<8x8xf32>
    %46 = arith.mulf %41, %45 : vector<8x8xf32>
    %47 = arith.truncf %46 : vector<8x8xf32> to vector<8x8xbf16>
    %cst_26 = arith.constant dense<0.000000e+00> : vector<8x8xf32>
    %48 = tpu.matmul %47, %33, %cst_26 {dimension_numbers = #tpu.dot_dimension_numbers<[1], [0], [0], [1], [0, 0, 1, 1], [], []>} : vector<8x8xbf16>, vector<8x8xbf16>, vector<8x8xf32> -> vector<8x8xf32>
    %49 = vector.extract_strided_slice %19 {offsets = [0, 8], sizes = [8, 8], strides = [1, 1]} : vector<8x32xbf16> to vector<8x8xbf16>
    %50 = vector.extract_strided_slice %21 {offsets = [0, 8], sizes = [8, 8], strides = [1, 1]} : vector<8x32xbf16> to vector<8x8xbf16>
    %51 = vector.extract_strided_slice %23 {offsets = [0, 8], sizes = [8, 8], strides = [1, 1]} : vector<8x32xbf16> to vector<8x8xbf16>
    "tpu.trace_start"() <{level = 10 : i32, message = "qd,kd->qk"}> : () -> ()
    %cst_27 = arith.constant dense<0.000000e+00> : vector<8x8xf32>
    %52 = tpu.matmul %49, %50, %cst_27 {dimension_numbers = #tpu.dot_dimension_numbers<[1], [1], [0], [0], [0, 0, 1, 0], [], []>} : vector<8x8xbf16>, vector<8x8xbf16>, vector<8x8xf32> -> vector<8x8xf32>
    %cst_28 = arith.constant -1.000000e+09 : f32
    "tpu.trace_stop"() : () -> ()
    %53 = vector.broadcast %cst_28 : f32 to vector<8x8xf32>
    %54 = arith.select %30, %53, %52 : vector<8x8xi1>, vector<8x8xf32>
    %cst_29 = arith.constant dense<0xFF800000> : vector<8xf32>
    %55 = vector.multi_reduction <maximumf>, %54, %cst_29 [1] : vector<8x8xf32> to vector<8xf32>
    %56 = vector.shape_cast %55 : vector<8xf32> to vector<8x1xf32>
    %57 = vector.broadcast %56 : vector<8x1xf32> to vector<8x8xf32>
    %58 = arith.subf %54, %57 : vector<8x8xf32>
    %59 = math.exp %58 : vector<8x8xf32>
    %cst_30 = arith.constant dense<0.000000e+00> : vector<8xf32>
    %60 = vector.multi_reduction <add>, %59, %cst_30 [1] : vector<8x8xf32> to vector<8xf32>
    %61 = vector.shape_cast %60 : vector<8xf32> to vector<8x1xf32>
    %62 = tpu.reciprocal %61 {approx = true} : vector<8x1xf32> -> vector<8x1xf32>
    %63 = vector.broadcast %62 : vector<8x1xf32> to vector<8x8xf32>
    %64 = arith.mulf %59, %63 : vector<8x8xf32>
    %65 = arith.truncf %64 : vector<8x8xf32> to vector<8x8xbf16>
    %cst_31 = arith.constant dense<0.000000e+00> : vector<8x8xf32>
    %66 = tpu.matmul %65, %51, %cst_31 {dimension_numbers = #tpu.dot_dimension_numbers<[1], [0], [0], [1], [0, 0, 1, 1], [], []>} : vector<8x8xbf16>, vector<8x8xbf16>, vector<8x8xf32> -> vector<8x8xf32>
    %67 = vector.extract_strided_slice %19 {offsets = [0, 16], sizes = [8, 8], strides = [1, 1]} : vector<8x32xbf16> to vector<8x8xbf16>
    %68 = vector.extract_strided_slice %21 {offsets = [0, 16], sizes = [8, 8], strides = [1, 1]} : vector<8x32xbf16> to vector<8x8xbf16>
    %69 = vector.extract_strided_slice %23 {offsets = [0, 16], sizes = [8, 8], strides = [1, 1]} : vector<8x32xbf16> to vector<8x8xbf16>
    "tpu.trace_start"() <{level = 10 : i32, message = "qd,kd->qk"}> : () -> ()
    %cst_32 = arith.constant dense<0.000000e+00> : vector<8x8xf32>
    %70 = tpu.matmul %67, %68, %cst_32 {dimension_numbers = #tpu.dot_dimension_numbers<[1], [1], [0], [0], [0, 0, 1, 0], [], []>} : vector<8x8xbf16>, vector<8x8xbf16>, vector<8x8xf32> -> vector<8x8xf32>
    %cst_33 = arith.constant -1.000000e+09 : f32
    "tpu.trace_stop"() : () -> ()
    %71 = vector.broadcast %cst_33 : f32 to vector<8x8xf32>
    %72 = arith.select %30, %71, %70 : vector<8x8xi1>, vector<8x8xf32>
    %cst_34 = arith.constant dense<0xFF800000> : vector<8xf32>
    %73 = vector.multi_reduction <maximumf>, %72, %cst_34 [1] : vector<8x8xf32> to vector<8xf32>
    %74 = vector.shape_cast %73 : vector<8xf32> to vector<8x1xf32>
    %75 = vector.broadcast %74 : vector<8x1xf32> to vector<8x8xf32>
    %76 = arith.subf %72, %75 : vector<8x8xf32>
    %77 = math.exp %76 : vector<8x8xf32>
    %cst_35 = arith.constant dense<0.000000e+00> : vector<8xf32>
    %78 = vector.multi_reduction <add>, %77, %cst_35 [1] : vector<8x8xf32> to vector<8xf32>
    %79 = vector.shape_cast %78 : vector<8xf32> to vector<8x1xf32>
    %80 = tpu.reciprocal %79 {approx = true} : vector<8x1xf32> -> vector<8x1xf32>
    %81 = vector.broadcast %80 : vector<8x1xf32> to vector<8x8xf32>
    %82 = arith.mulf %77, %81 : vector<8x8xf32>
    %83 = arith.truncf %82 : vector<8x8xf32> to vector<8x8xbf16>
    %cst_36 = arith.constant dense<0.000000e+00> : vector<8x8xf32>
    %84 = tpu.matmul %83, %69, %cst_36 {dimension_numbers = #tpu.dot_dimension_numbers<[1], [0], [0], [1], [0, 0, 1, 1], [], []>} : vector<8x8xbf16>, vector<8x8xbf16>, vector<8x8xf32> -> vector<8x8xf32>
    %85 = vector.extract_strided_slice %19 {offsets = [0, 24], sizes = [8, 8], strides = [1, 1]} : vector<8x32xbf16> to vector<8x8xbf16>
    %86 = vector.extract_strided_slice %21 {offsets = [0, 24], sizes = [8, 8], strides = [1, 1]} : vector<8x32xbf16> to vector<8x8xbf16>
    %87 = vector.extract_strided_slice %23 {offsets = [0, 24], sizes = [8, 8], strides = [1, 1]} : vector<8x32xbf16> to vector<8x8xbf16>
    "tpu.trace_start"() <{level = 10 : i32, message = "qd,kd->qk"}> : () -> ()
    %cst_37 = arith.constant dense<0.000000e+00> : vector<8x8xf32>
    %88 = tpu.matmul %85, %86, %cst_37 {dimension_numbers = #tpu.dot_dimension_numbers<[1], [1], [0], [0], [0, 0, 1, 0], [], []>} : vector<8x8xbf16>, vector<8x8xbf16>, vector<8x8xf32> -> vector<8x8xf32>
    %cst_38 = arith.constant -1.000000e+09 : f32
    "tpu.trace_stop"() : () -> ()
    %89 = vector.broadcast %cst_38 : f32 to vector<8x8xf32>
    %90 = arith.select %30, %89, %88 : vector<8x8xi1>, vector<8x8xf32>
    %cst_39 = arith.constant dense<0xFF800000> : vector<8xf32>
    %91 = vector.multi_reduction <maximumf>, %90, %cst_39 [1] : vector<8x8xf32> to vector<8xf32>
    %92 = vector.shape_cast %91 : vector<8xf32> to vector<8x1xf32>
    %93 = vector.broadcast %92 : vector<8x1xf32> to vector<8x8xf32>
    %94 = arith.subf %90, %93 : vector<8x8xf32>
    %95 = math.exp %94 : vector<8x8xf32>
    %cst_40 = arith.constant dense<0.000000e+00> : vector<8xf32>
    %96 = vector.multi_reduction <add>, %95, %cst_40 [1] : vector<8x8xf32> to vector<8xf32>
    %97 = vector.shape_cast %96 : vector<8xf32> to vector<8x1xf32>
    %98 = tpu.reciprocal %97 {approx = true} : vector<8x1xf32> -> vector<8x1xf32>
    %99 = vector.broadcast %98 : vector<8x1xf32> to vector<8x8xf32>
    %100 = arith.mulf %95, %99 : vector<8x8xf32>
    %101 = arith.truncf %100 : vector<8x8xf32> to vector<8x8xbf16>
    %cst_41 = arith.constant dense<0.000000e+00> : vector<8x8xf32>
    %102 = tpu.matmul %101, %87, %cst_41 {dimension_numbers = #tpu.dot_dimension_numbers<[1], [0], [0], [1], [0, 0, 1, 1], [], []>} : vector<8x8xbf16>, vector<8x8xbf16>, vector<8x8xf32> -> vector<8x8xf32>
    %103 = tpu.concatenate %48, %66, %84, %102 in 1 : vector<8x8xf32>, vector<8x8xf32>, vector<8x8xf32>, vector<8x8xf32> -> vector<8x32xf32>
    %104 = arith.truncf %103 : vector<8x32xf32> to vector<8x32xbf16>
    %cst_42 = arith.constant dense<0.000000e+00> : vector<8x32xf32>
    %105 = tpu.matmul %104, %8, %cst_42 {dimension_numbers = #tpu.dot_dimension_numbers<[1], [0], [0], [1], [0, 0, 1, 1], [], []>} : vector<8x32xbf16>, vector<32x32xbf16>, vector<8x32xf32> -> vector<8x32xf32>
    %106 = vector.broadcast %9 : vector<1x32xf32> to vector<8x32xf32>
    %107 = arith.addf %105, %106 : vector<8x32xf32>
    %108 = arith.addf %107, %0 : vector<8x32xf32>
    %cst_43 = arith.constant dense<0.000000e+00> : vector<8xf32>
    %109 = vector.multi_reduction <add>, %108, %cst_43 [1] : vector<8x32xf32> to vector<8xf32>
    %110 = vector.shape_cast %109 : vector<8xf32> to vector<8x1xf32>
    %cst_44 = arith.constant 3.200000e+01 : f32
    %111 = vector.broadcast %cst_44 : f32 to vector<8x1xf32>
    %112 = arith.divf %110, %111 : vector<8x1xf32>
    %113 = vector.broadcast %112 : vector<8x1xf32> to vector<8x32xf32>
    %114 = arith.subf %108, %113 : vector<8x32xf32>
    %115 = arith.mulf %114, %114 : vector<8x32xf32>
    %cst_45 = arith.constant dense<0.000000e+00> : vector<8xf32>
    %116 = vector.multi_reduction <add>, %115, %cst_45 [1] : vector<8x32xf32> to vector<8xf32>
    %117 = vector.shape_cast %116 : vector<8xf32> to vector<8x1xf32>
    %cst_46 = arith.constant 3.200000e+01 : f32
    %118 = vector.broadcast %cst_46 : f32 to vector<8x1xf32>
    %119 = arith.divf %117, %118 : vector<8x1xf32>
    %120 = vector.broadcast %112 : vector<8x1xf32> to vector<8x32xf32>
    %121 = arith.subf %108, %120 : vector<8x32xf32>
    %cst_47 = arith.constant 9.99999974E-6 : f32
    %122 = vector.broadcast %cst_47 : f32 to vector<8x1xf32>
    %123 = arith.addf %119, %122 : vector<8x1xf32>
    %124 = math.rsqrt %123 : vector<8x1xf32>
    %125 = vector.broadcast %124 : vector<8x1xf32> to vector<8x32xf32>
    %126 = arith.mulf %121, %125 : vector<8x32xf32>
    %127 = vector.broadcast %10 : vector<1x32xf32> to vector<8x32xf32>
    %128 = arith.mulf %126, %127 : vector<8x32xf32>
    %129 = vector.broadcast %11 : vector<1x32xf32> to vector<8x32xf32>
    %130 = arith.addf %128, %129 : vector<8x32xf32>
    %131 = vector.broadcast %3 : vector<8x1xf32> to vector<8x32xf32>
    %132 = arith.mulf %130, %131 : vector<8x32xf32>
    %c0_48 = arith.constant 0 : index
    %c0_49 = arith.constant 0 : index
    %c0_50 = arith.constant 0 : index
    %133 = vector.load %arg4[%c0_48, %c0_49, %c0_50] : memref<1x1x8xi32, #tpu.memory_space<vmem>>, vector<1x1x8xi32>
    %134 = vector.shape_cast %133 : vector<1x1x8xi32> to vector<1x8xi32>
    %c0_51 = arith.constant 0 : index
    %c0_52 = arith.constant 0 : index
    %135 = vector.load %arg12[%c0_51, %c0_52] : memref<32x32xbf16, #tpu.memory_space<vmem>>, vector<32x32xbf16>
    %c0_53 = arith.constant 0 : index
    %c0_54 = arith.constant 0 : index
    %136 = vector.load %arg13[%c0_53, %c0_54] : memref<1x32xf32, #tpu.memory_space<vmem>>, vector<1x32xf32>
    %c0_55 = arith.constant 0 : index
    %c0_56 = arith.constant 0 : index
    %137 = vector.load %arg14[%c0_55, %c0_56] : memref<32x64xbf16, #tpu.memory_space<vmem>>, vector<32x64xbf16>
    %c0_57 = arith.constant 0 : index
    %c0_58 = arith.constant 0 : index
    %138 = vector.load %arg15[%c0_57, %c0_58] : memref<1x64xf32, #tpu.memory_space<vmem>>, vector<1x64xf32>
    %c0_59 = arith.constant 0 : index
    %c0_60 = arith.constant 0 : index
    %139 = vector.load %arg16[%c0_59, %c0_60] : memref<32x32xbf16, #tpu.memory_space<vmem>>, vector<32x32xbf16>
    %c0_61 = arith.constant 0 : index
    %c0_62 = arith.constant 0 : index
    %140 = vector.load %arg17[%c0_61, %c0_62] : memref<1x32xf32, #tpu.memory_space<vmem>>, vector<1x32xf32>
    %c0_63 = arith.constant 0 : index
    %c0_64 = arith.constant 0 : index
    %141 = vector.load %arg18[%c0_63, %c0_64] : memref<1x32xf32, #tpu.memory_space<vmem>>, vector<1x32xf32>
    %c0_65 = arith.constant 0 : index
    %c0_66 = arith.constant 0 : index
    %142 = vector.load %arg19[%c0_65, %c0_66] : memref<1x32xf32, #tpu.memory_space<vmem>>, vector<1x32xf32>
    %143 = arith.truncf %132 : vector<8x32xf32> to vector<8x32xbf16>
    %cst_67 = arith.constant dense<0.000000e+00> : vector<8x32xf32>
    %144 = tpu.matmul %143, %135, %cst_67 {dimension_numbers = #tpu.dot_dimension_numbers<[1], [0], [0], [1], [0, 0, 1, 1], [], []>} : vector<8x32xbf16>, vector<32x32xbf16>, vector<8x32xf32> -> vector<8x32xf32>
    %145 = vector.broadcast %136 : vector<1x32xf32> to vector<8x32xf32>
    %146 = arith.addf %144, %145 : vector<8x32xf32>
    %cst_68 = arith.constant dense<0.000000e+00> : vector<8x64xf32>
    %147 = tpu.matmul %2, %137, %cst_68 {dimension_numbers = #tpu.dot_dimension_numbers<[1], [0], [0], [1], [0, 0, 1, 1], [], []>} : vector<8x32xbf16>, vector<32x64xbf16>, vector<8x64xf32> -> vector<8x64xf32>
    %148 = vector.broadcast %138 : vector<1x64xf32> to vector<8x64xf32>
    %149 = arith.addf %147, %148 : vector<8x64xf32>
    %cst_69 = arith.constant 0.353553385 : f32
    %150 = vector.broadcast %cst_69 : f32 to vector<8x32xf32>
    %151 = arith.mulf %146, %150 : vector<8x32xf32>
    %152 = arith.truncf %151 : vector<8x32xf32> to vector<8x32xbf16>
    %153 = vector.extract_strided_slice %149 {offsets = [0, 0], sizes = [8, 32], strides = [1, 1]} : vector<8x64xf32> to vector<8x32xf32>
    %154 = arith.truncf %153 : vector<8x32xf32> to vector<8x32xbf16>
    %155 = vector.extract_strided_slice %149 {offsets = [0, 32], sizes = [8, 32], strides = [1, 1]} : vector<8x64xf32> to vector<8x32xf32>
    %156 = arith.truncf %155 : vector<8x32xf32> to vector<8x32xbf16>
    %c0_i32_70 = arith.constant 0 : i32
    %157 = vector.broadcast %c0_i32_70 : i32 to vector<1x8xi32>
    %158 = arith.cmpi eq, %134, %157 : vector<1x8xi32>
    %159 = vector.extract_strided_slice %152 {offsets = [0, 0], sizes = [8, 8], strides = [1, 1]} : vector<8x32xbf16> to vector<8x8xbf16>
    %160 = vector.extract_strided_slice %154 {offsets = [0, 0], sizes = [8, 8], strides = [1, 1]} : vector<8x32xbf16> to vector<8x8xbf16>
    %161 = vector.extract_strided_slice %156 {offsets = [0, 0], sizes = [8, 8], strides = [1, 1]} : vector<8x32xbf16> to vector<8x8xbf16>
    "tpu.trace_start"() <{level = 10 : i32, message = "qd,kd->qk"}> : () -> ()
    %cst_71 = arith.constant dense<0.000000e+00> : vector<8x8xf32>
    %162 = tpu.matmul %159, %160, %cst_71 {dimension_numbers = #tpu.dot_dimension_numbers<[1], [1], [0], [0], [0, 0, 1, 0], [], []>} : vector<8x8xbf16>, vector<8x8xbf16>, vector<8x8xf32> -> vector<8x8xf32>
    %cst_72 = arith.constant -1.000000e+09 : f32
    "tpu.trace_stop"() : () -> ()
    %163 = vector.shape_cast %158 : vector<1x8xi1> to vector<1x8xi1>
    %164 = vector.broadcast %163 : vector<1x8xi1> to vector<8x8xi1>
    %165 = vector.broadcast %cst_72 : f32 to vector<8x8xf32>
    %166 = arith.select %164, %165, %162 : vector<8x8xi1>, vector<8x8xf32>
    %cst_73 = arith.constant dense<0xFF800000> : vector<8xf32>
    %167 = vector.multi_reduction <maximumf>, %166, %cst_73 [1] : vector<8x8xf32> to vector<8xf32>
    %168 = vector.shape_cast %167 : vector<8xf32> to vector<8x1xf32>
    %169 = vector.broadcast %168 : vector<8x1xf32> to vector<8x8xf32>
    %170 = arith.subf %166, %169 : vector<8x8xf32>
    %171 = math.exp %170 : vector<8x8xf32>
    %cst_74 = arith.constant dense<0.000000e+00> : vector<8xf32>
    %172 = vector.multi_reduction <add>, %171, %cst_74 [1] : vector<8x8xf32> to vector<8xf32>
    %173 = vector.shape_cast %172 : vector<8xf32> to vector<8x1xf32>
    %174 = tpu.reciprocal %173 {approx = true} : vector<8x1xf32> -> vector<8x1xf32>
    %175 = vector.broadcast %174 : vector<8x1xf32> to vector<8x8xf32>
    %176 = arith.mulf %171, %175 : vector<8x8xf32>
    %177 = arith.truncf %176 : vector<8x8xf32> to vector<8x8xbf16>
    %cst_75 = arith.constant dense<0.000000e+00> : vector<8x8xf32>
    %178 = tpu.matmul %177, %161, %cst_75 {dimension_numbers = #tpu.dot_dimension_numbers<[1], [0], [0], [1], [0, 0, 1, 1], [], []>} : vector<8x8xbf16>, vector<8x8xbf16>, vector<8x8xf32> -> vector<8x8xf32>
    %179 = vector.extract_strided_slice %152 {offsets = [0, 8], sizes = [8, 8], strides = [1, 1]} : vector<8x32xbf16> to vector<8x8xbf16>
    %180 = vector.extract_strided_slice %154 {offsets = [0, 8], sizes = [8, 8], strides = [1, 1]} : vector<8x32xbf16> to vector<8x8xbf16>
    %181 = vector.extract_strided_slice %156 {offsets = [0, 8], sizes = [8, 8], strides = [1, 1]} : vector<8x32xbf16> to vector<8x8xbf16>
    "tpu.trace_start"() <{level = 10 : i32, message = "qd,kd->qk"}> : () -> ()
    %cst_76 = arith.constant dense<0.000000e+00> : vector<8x8xf32>
    %182 = tpu.matmul %179, %180, %cst_76 {dimension_numbers = #tpu.dot_dimension_numbers<[1], [1], [0], [0], [0, 0, 1, 0], [], []>} : vector<8x8xbf16>, vector<8x8xbf16>, vector<8x8xf32> -> vector<8x8xf32>
    %cst_77 = arith.constant -1.000000e+09 : f32
    "tpu.trace_stop"() : () -> ()
    %183 = vector.shape_cast %158 : vector<1x8xi1> to vector<1x8xi1>
    %184 = vector.broadcast %183 : vector<1x8xi1> to vector<8x8xi1>
    %185 = vector.broadcast %cst_77 : f32 to vector<8x8xf32>
    %186 = arith.select %184, %185, %182 : vector<8x8xi1>, vector<8x8xf32>
    %cst_78 = arith.constant dense<0xFF800000> : vector<8xf32>
    %187 = vector.multi_reduction <maximumf>, %186, %cst_78 [1] : vector<8x8xf32> to vector<8xf32>
    %188 = vector.shape_cast %187 : vector<8xf32> to vector<8x1xf32>
    %189 = vector.broadcast %188 : vector<8x1xf32> to vector<8x8xf32>
    %190 = arith.subf %186, %189 : vector<8x8xf32>
    %191 = math.exp %190 : vector<8x8xf32>
    %cst_79 = arith.constant dense<0.000000e+00> : vector<8xf32>
    %192 = vector.multi_reduction <add>, %191, %cst_79 [1] : vector<8x8xf32> to vector<8xf32>
    %193 = vector.shape_cast %192 : vector<8xf32> to vector<8x1xf32>
    %194 = tpu.reciprocal %193 {approx = true} : vector<8x1xf32> -> vector<8x1xf32>
    %195 = vector.broadcast %194 : vector<8x1xf32> to vector<8x8xf32>
    %196 = arith.mulf %191, %195 : vector<8x8xf32>
    %197 = arith.truncf %196 : vector<8x8xf32> to vector<8x8xbf16>
    %cst_80 = arith.constant dense<0.000000e+00> : vector<8x8xf32>
    %198 = tpu.matmul %197, %181, %cst_80 {dimension_numbers = #tpu.dot_dimension_numbers<[1], [0], [0], [1], [0, 0, 1, 1], [], []>} : vector<8x8xbf16>, vector<8x8xbf16>, vector<8x8xf32> -> vector<8x8xf32>
    %199 = vector.extract_strided_slice %152 {offsets = [0, 16], sizes = [8, 8], strides = [1, 1]} : vector<8x32xbf16> to vector<8x8xbf16>
    %200 = vector.extract_strided_slice %154 {offsets = [0, 16], sizes = [8, 8], strides = [1, 1]} : vector<8x32xbf16> to vector<8x8xbf16>
    %201 = vector.extract_strided_slice %156 {offsets = [0, 16], sizes = [8, 8], strides = [1, 1]} : vector<8x32xbf16> to vector<8x8xbf16>
    "tpu.trace_start"() <{level = 10 : i32, message = "qd,kd->qk"}> : () -> ()
    %cst_81 = arith.constant dense<0.000000e+00> : vector<8x8xf32>
    %202 = tpu.matmul %199, %200, %cst_81 {dimension_numbers = #tpu.dot_dimension_numbers<[1], [1], [0], [0], [0, 0, 1, 0], [], []>} : vector<8x8xbf16>, vector<8x8xbf16>, vector<8x8xf32> -> vector<8x8xf32>
    %cst_82 = arith.constant -1.000000e+09 : f32
    "tpu.trace_stop"() : () -> ()
    %203 = vector.shape_cast %158 : vector<1x8xi1> to vector<1x8xi1>
    %204 = vector.broadcast %203 : vector<1x8xi1> to vector<8x8xi1>
    %205 = vector.broadcast %cst_82 : f32 to vector<8x8xf32>
    %206 = arith.select %204, %205, %202 : vector<8x8xi1>, vector<8x8xf32>
    %cst_83 = arith.constant dense<0xFF800000> : vector<8xf32>
    %207 = vector.multi_reduction <maximumf>, %206, %cst_83 [1] : vector<8x8xf32> to vector<8xf32>
    %208 = vector.shape_cast %207 : vector<8xf32> to vector<8x1xf32>
    %209 = vector.broadcast %208 : vector<8x1xf32> to vector<8x8xf32>
    %210 = arith.subf %206, %209 : vector<8x8xf32>
    %211 = math.exp %210 : vector<8x8xf32>
    %cst_84 = arith.constant dense<0.000000e+00> : vector<8xf32>
    %212 = vector.multi_reduction <add>, %211, %cst_84 [1] : vector<8x8xf32> to vector<8xf32>
    %213 = vector.shape_cast %212 : vector<8xf32> to vector<8x1xf32>
    %214 = tpu.reciprocal %213 {approx = true} : vector<8x1xf32> -> vector<8x1xf32>
    %215 = vector.broadcast %214 : vector<8x1xf32> to vector<8x8xf32>
    %216 = arith.mulf %211, %215 : vector<8x8xf32>
    %217 = arith.truncf %216 : vector<8x8xf32> to vector<8x8xbf16>
    %cst_85 = arith.constant dense<0.000000e+00> : vector<8x8xf32>
    %218 = tpu.matmul %217, %201, %cst_85 {dimension_numbers = #tpu.dot_dimension_numbers<[1], [0], [0], [1], [0, 0, 1, 1], [], []>} : vector<8x8xbf16>, vector<8x8xbf16>, vector<8x8xf32> -> vector<8x8xf32>
    %219 = vector.extract_strided_slice %152 {offsets = [0, 24], sizes = [8, 8], strides = [1, 1]} : vector<8x32xbf16> to vector<8x8xbf16>
    %220 = vector.extract_strided_slice %154 {offsets = [0, 24], sizes = [8, 8], strides = [1, 1]} : vector<8x32xbf16> to vector<8x8xbf16>
    %221 = vector.extract_strided_slice %156 {offsets = [0, 24], sizes = [8, 8], strides = [1, 1]} : vector<8x32xbf16> to vector<8x8xbf16>
    "tpu.trace_start"() <{level = 10 : i32, message = "qd,kd->qk"}> : () -> ()
    %cst_86 = arith.constant dense<0.000000e+00> : vector<8x8xf32>
    %222 = tpu.matmul %219, %220, %cst_86 {dimension_numbers = #tpu.dot_dimension_numbers<[1], [1], [0], [0], [0, 0, 1, 0], [], []>} : vector<8x8xbf16>, vector<8x8xbf16>, vector<8x8xf32> -> vector<8x8xf32>
    %cst_87 = arith.constant -1.000000e+09 : f32
    "tpu.trace_stop"() : () -> ()
    %223 = vector.shape_cast %158 : vector<1x8xi1> to vector<1x8xi1>
    %224 = vector.broadcast %223 : vector<1x8xi1> to vector<8x8xi1>
    %225 = vector.broadcast %cst_87 : f32 to vector<8x8xf32>
    %226 = arith.select %224, %225, %222 : vector<8x8xi1>, vector<8x8xf32>
    %cst_88 = arith.constant dense<0xFF800000> : vector<8xf32>
    %227 = vector.multi_reduction <maximumf>, %226, %cst_88 [1] : vector<8x8xf32> to vector<8xf32>
    %228 = vector.shape_cast %227 : vector<8xf32> to vector<8x1xf32>
    %229 = vector.broadcast %228 : vector<8x1xf32> to vector<8x8xf32>
    %230 = arith.subf %226, %229 : vector<8x8xf32>
    %231 = math.exp %230 : vector<8x8xf32>
    %cst_89 = arith.constant dense<0.000000e+00> : vector<8xf32>
    %232 = vector.multi_reduction <add>, %231, %cst_89 [1] : vector<8x8xf32> to vector<8xf32>
    %233 = vector.shape_cast %232 : vector<8xf32> to vector<8x1xf32>
    %234 = tpu.reciprocal %233 {approx = true} : vector<8x1xf32> -> vector<8x1xf32>
    %235 = vector.broadcast %234 : vector<8x1xf32> to vector<8x8xf32>
    %236 = arith.mulf %231, %235 : vector<8x8xf32>
    %237 = arith.truncf %236 : vector<8x8xf32> to vector<8x8xbf16>
    %cst_90 = arith.constant dense<0.000000e+00> : vector<8x8xf32>
    %238 = tpu.matmul %237, %221, %cst_90 {dimension_numbers = #tpu.dot_dimension_numbers<[1], [0], [0], [1], [0, 0, 1, 1], [], []>} : vector<8x8xbf16>, vector<8x8xbf16>, vector<8x8xf32> -> vector<8x8xf32>
    %239 = tpu.concatenate %178, %198, %218, %238 in 1 : vector<8x8xf32>, vector<8x8xf32>, vector<8x8xf32>, vector<8x8xf32> -> vector<8x32xf32>
    %240 = arith.truncf %239 : vector<8x32xf32> to vector<8x32xbf16>
    %cst_91 = arith.constant dense<0.000000e+00> : vector<8x32xf32>
    %241 = tpu.matmul %240, %139, %cst_91 {dimension_numbers = #tpu.dot_dimension_numbers<[1], [0], [0], [1], [0, 0, 1, 1], [], []>} : vector<8x32xbf16>, vector<32x32xbf16>, vector<8x32xf32> -> vector<8x32xf32>
    %242 = vector.broadcast %140 : vector<1x32xf32> to vector<8x32xf32>
    %243 = arith.addf %241, %242 : vector<8x32xf32>
    %244 = arith.addf %243, %132 : vector<8x32xf32>
    %cst_92 = arith.constant dense<0.000000e+00> : vector<8xf32>
    %245 = vector.multi_reduction <add>, %244, %cst_92 [1] : vector<8x32xf32> to vector<8xf32>
    %246 = vector.shape_cast %245 : vector<8xf32> to vector<8x1xf32>
    %cst_93 = arith.constant 3.200000e+01 : f32
    %247 = vector.broadcast %cst_93 : f32 to vector<8x1xf32>
    %248 = arith.divf %246, %247 : vector<8x1xf32>
    %249 = vector.broadcast %248 : vector<8x1xf32> to vector<8x32xf32>
    %250 = arith.subf %244, %249 : vector<8x32xf32>
    %251 = arith.mulf %250, %250 : vector<8x32xf32>
    %cst_94 = arith.constant dense<0.000000e+00> : vector<8xf32>
    %252 = vector.multi_reduction <add>, %251, %cst_94 [1] : vector<8x32xf32> to vector<8xf32>
    %253 = vector.shape_cast %252 : vector<8xf32> to vector<8x1xf32>
    %cst_95 = arith.constant 3.200000e+01 : f32
    %254 = vector.broadcast %cst_95 : f32 to vector<8x1xf32>
    %255 = arith.divf %253, %254 : vector<8x1xf32>
    %256 = vector.broadcast %248 : vector<8x1xf32> to vector<8x32xf32>
    %257 = arith.subf %244, %256 : vector<8x32xf32>
    %cst_96 = arith.constant 9.99999974E-6 : f32
    %258 = vector.broadcast %cst_96 : f32 to vector<8x1xf32>
    %259 = arith.addf %255, %258 : vector<8x1xf32>
    %260 = math.rsqrt %259 : vector<8x1xf32>
    %261 = vector.broadcast %260 : vector<8x1xf32> to vector<8x32xf32>
    %262 = arith.mulf %257, %261 : vector<8x32xf32>
    %263 = vector.broadcast %141 : vector<1x32xf32> to vector<8x32xf32>
    %264 = arith.mulf %262, %263 : vector<8x32xf32>
    %265 = vector.broadcast %142 : vector<1x32xf32> to vector<8x32xf32>
    %266 = arith.addf %264, %265 : vector<8x32xf32>
    %267 = vector.broadcast %3 : vector<8x1xf32> to vector<8x32xf32>
    %268 = arith.mulf %266, %267 : vector<8x32xf32>
    %c0_97 = arith.constant 0 : index
    %c0_98 = arith.constant 0 : index
    %269 = vector.load %arg20[%c0_97, %c0_98] : memref<32x64xbf16, #tpu.memory_space<vmem>>, vector<32x64xbf16>
    %c0_99 = arith.constant 0 : index
    %c0_100 = arith.constant 0 : index
    %270 = vector.load %arg21[%c0_99, %c0_100] : memref<1x64xf32, #tpu.memory_space<vmem>>, vector<1x64xf32>
    %c0_101 = arith.constant 0 : index
    %c0_102 = arith.constant 0 : index
    %271 = vector.load %arg22[%c0_101, %c0_102] : memref<64x32xbf16, #tpu.memory_space<vmem>>, vector<64x32xbf16>
    %c0_103 = arith.constant 0 : index
    %c0_104 = arith.constant 0 : index
    %272 = vector.load %arg23[%c0_103, %c0_104] : memref<1x32xf32, #tpu.memory_space<vmem>>, vector<1x32xf32>
    %c0_105 = arith.constant 0 : index
    %c0_106 = arith.constant 0 : index
    %273 = vector.load %arg24[%c0_105, %c0_106] : memref<1x32xf32, #tpu.memory_space<vmem>>, vector<1x32xf32>
    %c0_107 = arith.constant 0 : index
    %c0_108 = arith.constant 0 : index
    %274 = vector.load %arg25[%c0_107, %c0_108] : memref<1x32xf32, #tpu.memory_space<vmem>>, vector<1x32xf32>
    %275 = arith.truncf %268 : vector<8x32xf32> to vector<8x32xbf16>
    %cst_109 = arith.constant dense<0.000000e+00> : vector<8x64xf32>
    %276 = tpu.matmul %275, %269, %cst_109 {dimension_numbers = #tpu.dot_dimension_numbers<[1], [0], [0], [1], [0, 0, 1, 1], [], []>} : vector<8x32xbf16>, vector<32x64xbf16>, vector<8x64xf32> -> vector<8x64xf32>
    %277 = vector.broadcast %270 : vector<1x64xf32> to vector<8x64xf32>
    %278 = arith.addf %276, %277 : vector<8x64xf32>
    %cst_110 = arith.constant 0.000000e+00 : f32
    %279 = vector.broadcast %cst_110 : f32 to vector<8x64xf32>
    %280 = arith.maximumf %278, %279 : vector<8x64xf32>
    %281 = arith.truncf %280 : vector<8x64xf32> to vector<8x64xbf16>
    %cst_111 = arith.constant dense<0.000000e+00> : vector<8x32xf32>
    %282 = tpu.matmul %281, %271, %cst_111 {dimension_numbers = #tpu.dot_dimension_numbers<[1], [0], [0], [1], [0, 0, 1, 1], [], []>} : vector<8x64xbf16>, vector<64x32xbf16>, vector<8x32xf32> -> vector<8x32xf32>
    %283 = vector.broadcast %272 : vector<1x32xf32> to vector<8x32xf32>
    %284 = arith.addf %282, %283 : vector<8x32xf32>
    %285 = arith.addf %284, %268 : vector<8x32xf32>
    %cst_112 = arith.constant dense<0.000000e+00> : vector<8xf32>
    %286 = vector.multi_reduction <add>, %285, %cst_112 [1] : vector<8x32xf32> to vector<8xf32>
    %287 = vector.shape_cast %286 : vector<8xf32> to vector<8x1xf32>
    %cst_113 = arith.constant 3.200000e+01 : f32
    %288 = vector.broadcast %cst_113 : f32 to vector<8x1xf32>
    %289 = arith.divf %287, %288 : vector<8x1xf32>
    %290 = vector.broadcast %289 : vector<8x1xf32> to vector<8x32xf32>
    %291 = arith.subf %285, %290 : vector<8x32xf32>
    %292 = arith.mulf %291, %291 : vector<8x32xf32>
    %cst_114 = arith.constant dense<0.000000e+00> : vector<8xf32>
    %293 = vector.multi_reduction <add>, %292, %cst_114 [1] : vector<8x32xf32> to vector<8xf32>
    %294 = vector.shape_cast %293 : vector<8xf32> to vector<8x1xf32>
    %cst_115 = arith.constant 3.200000e+01 : f32
    %295 = vector.broadcast %cst_115 : f32 to vector<8x1xf32>
    %296 = arith.divf %294, %295 : vector<8x1xf32>
    %297 = vector.broadcast %289 : vector<8x1xf32> to vector<8x32xf32>
    %298 = arith.subf %285, %297 : vector<8x32xf32>
    %cst_116 = arith.constant 9.99999974E-6 : f32
    %299 = vector.broadcast %cst_116 : f32 to vector<8x1xf32>
    %300 = arith.addf %296, %299 : vector<8x1xf32>
    %301 = math.rsqrt %300 : vector<8x1xf32>
    %302 = vector.broadcast %301 : vector<8x1xf32> to vector<8x32xf32>
    %303 = arith.mulf %298, %302 : vector<8x32xf32>
    %304 = vector.broadcast %273 : vector<1x32xf32> to vector<8x32xf32>
    %305 = arith.mulf %303, %304 : vector<8x32xf32>
    %306 = vector.broadcast %274 : vector<1x32xf32> to vector<8x32xf32>
    %307 = arith.addf %305, %306 : vector<8x32xf32>
    %308 = vector.broadcast %3 : vector<8x1xf32> to vector<8x32xf32>
    %309 = arith.mulf %307, %308 : vector<8x32xf32>
    %c0_117 = arith.constant 0 : index
    %c0_118 = arith.constant 0 : index
    %310 = vector.load %arg26[%c0_117, %c0_118] : memref<8x32xf32, #tpu.memory_space<vmem>>, vector<8x32xf32>
    tpu.vector_store %arg26[%c0_117, %c0_118], %309 {strides = array<i32>} : memref<8x32xf32, #tpu.memory_space<vmem>>, vector<8x32xf32>,
    return
  }
  func.func @transform_0(%arg0: i32) -> (i32, i32) {
    %c0_i32 = arith.constant 0 : i32
    %c0_i32_0 = arith.constant 0 : i32
    return %arg0, %c0_i32 : i32, i32
  }
  func.func @transform_1(%arg0: i32) -> (i32, i32, i32) {
    %c0_i32 = arith.constant 0 : i32
    %c0_i32_0 = arith.constant 0 : i32
    %c0_i32_1 = arith.constant 0 : i32
    return %arg0, %c0_i32, %c0_i32_0 : i32, i32, i32
  }
  func.func @transform_2(%arg0: i32) -> (i32, i32, i32) {
    %c0_i32 = arith.constant 0 : i32
    %c0_i32_0 = arith.constant 0 : i32
    %c0_i32_1 = arith.constant 0 : i32
    return %arg0, %c0_i32, %c0_i32_0 : i32, i32, i32
  }
  func.func @transform_3(%arg0: i32) -> (i32, i32, i32) {
    %c0_i32 = arith.constant 0 : i32
    %c0_i32_0 = arith.constant 0 : i32
    %c0_i32_1 = arith.constant 0 : i32
    return %arg0, %c0_i32, %c0_i32_0 : i32, i32, i32
  }
  func.func @transform_4(%arg0: i32) -> (i32, i32) {
    %c0_i32 = arith.constant 0 : i32
    %c0_i32_0 = arith.constant 0 : i32
    return %arg0, %c0_i32 : i32, i32
  }
  func.func @transform_5(%arg0: i32) -> (i32, i32) {
    %c0_i32 = arith.constant 0 : i32
    %c0_i32_0 = arith.constant 0 : i32
    %c0_i32_1 = arith.constant 0 : i32
    return %c0_i32, %c0_i32_0 : i32, i32
  }
  func.func @transform_6(%arg0: i32) -> (i32, i32) {
    %c0_i32 = arith.constant 0 : i32
    %c0_i32_0 = arith.constant 0 : i32
    %c0_i32_1 = arith.constant 0 : i32
    return %c0_i32, %c0_i32_0 : i32, i32
  }
  func.func @transform_7(%arg0: i32) -> (i32, i32) {
    %c0_i32 = arith.constant 0 : i32
    %c0_i32_0 = arith.constant 0 : i32
    %c0_i32_1 = arith.constant 0 : i32
    return %c0_i32, %c0_i32_0 : i32, i32
  }
  func.func @transform_8(%arg0: i32) -> (i32, i32) {
    %c0_i32 = arith.constant 0 : i32
    %c0_i32_0 = arith.constant 0 : i32
    %c0_i32_1 = arith.constant 0 : i32
    return %c0_i32, %c0_i32_0 : i32, i32
  }
  func.func @transform_9(%arg0: i32) -> (i32, i32) {
    %c0_i32 = arith.constant 0 : i32
    %c0_i32_0 = arith.constant 0 : i32
    %c0_i32_1 = arith.constant 0 : i32
    return %c0_i32, %c0_i32_0 : i32, i32
  }
  func.func @transform_10(%arg0: i32) -> (i32, i32) {
    %c0_i32 = arith.constant 0 : i32
    %c0_i32_0 = arith.constant 0 : i32
    %c0_i32_1 = arith.constant 0 : i32
    return %c0_i32, %c0_i32_0 : i32, i32
  }
  func.func @transform_11(%arg0: i32) -> (i32, i32) {
    %c0_i32 = arith.constant 0 : i32
    %c0_i32_0 = arith.constant 0 : i32
    %c0_i32_1 = arith.constant 0 : i32
    return %c0_i32, %c0_i32_0 : i32, i32
  }
  func.func @transform_12(%arg0: i32) -> (i32, i32) {
    %c0_i32 = arith.constant 0 : i32
    %c0_i32_0 = arith.constant 0 : i32
    %c0_i32_1 = arith.constant 0 : i32
    return %c0_i32, %c0_i32_0 : i32, i32
  }
  func.func @transform_13(%arg0: i32) -> (i32, i32) {
    %c0_i32 = arith.constant 0 : i32
    %c0_i32_0 = arith.constant 0 : i32
    %c0_i32_1 = arith.constant 0 : i32
    return %c0_i32, %c0_i32_0 : i32, i32
  }
  func.func @transform_14(%arg0: i32) -> (i32, i32) {
    %c0_i32 = arith.constant 0 : i32
    %c0_i32_0 = arith.constant 0 : i32
    %c0_i32_1 = arith.constant 0 : i32
    return %c0_i32, %c0_i32_0 : i32, i32
  }
  func.func @transform_15(%arg0: i32) -> (i32, i32) {
    %c0_i32 = arith.constant 0 : i32
    %c0_i32_0 = arith.constant 0 : i32
    %c0_i32_1 = arith.constant 0 : i32
    return %c0_i32, %c0_i32_0 : i32, i32
  }
  func.func @transform_16(%arg0: i32) -> (i32, i32) {
    %c0_i32 = arith.constant 0 : i32
    %c0_i32_0 = arith.constant 0 : i32
    %c0_i32_1 = arith.constant 0 : i32
    return %c0_i32, %c0_i32_0 : i32, i32
  }
  func.func @transform_17(%arg0: i32) -> (i32, i32) {
    %c0_i32 = arith.constant 0 : i32
    %c0_i32_0 = arith.constant 0 : i32
    %c0_i32_1 = arith.constant 0 : i32
    return %c0_i32, %c0_i32_0 : i32, i32
  }
  func.func @transform_18(%arg0: i32) -> (i32, i32) {
    %c0_i32 = arith.constant 0 : i32
    %c0_i32_0 = arith.constant 0 : i32
    %c0_i32_1 = arith.constant 0 : i32
    return %c0_i32, %c0_i32_0 : i32, i32
  }
  func.func @transform_19(%arg0: i32) -> (i32, i32) {
    %c0_i32 = arith.constant 0 : i32
    %c0_i32_0 = arith.constant 0 : i32
    %c0_i32_1 = arith.constant 0 : i32
    return %c0_i32, %c0_i32_0 : i32, i32
  }
  func.func @transform_20(%arg0: i32) -> (i32, i32) {
    %c0_i32 = arith.constant 0 : i32
    %c0_i32_0 = arith.constant 0 : i32
    %c0_i32_1 = arith.constant 0 : i32
    return %c0_i32, %c0_i32_0 : i32, i32
  }
  func.func @transform_21(%arg0: i32) -> (i32, i32) {
    %c0_i32 = arith.constant 0 : i32
    %c0_i32_0 = arith.constant 0 : i32
    %c0_i32_1 = arith.constant 0 : i32
    return %c0_i32, %c0_i32_0 : i32, i32
  }
  func.func @transform_22(%arg0: i32) -> (i32, i32) {
    %c0_i32 = arith.constant 0 : i32
    %c0_i32_0 = arith.constant 0 : i32
    %c0_i32_1 = arith.constant 0 : i32
    return %c0_i32, %c0_i32_0 : i32, i32
  }
  func.func @transform_23(%arg0: i32) -> (i32, i32) {
    %c0_i32 = arith.constant 0 : i32
    %c0_i32_0 = arith.constant 0 : i32
    %c0_i32_1 = arith.constant 0 : i32
    return %c0_i32, %c0_i32_0 : i32, i32
  }
  func.func @transform_24(%arg0: i32) -> (i32, i32) {
    %c0_i32 = arith.constant 0 : i32
    %c0_i32_0 = arith.constant 0 : i32
    %c0_i32_1 = arith.constant 0 : i32
    return %c0_i32, %c0_i32_0 : i32, i32
  }
  func.func @transform_25(%arg0: i32) -> (i32, i32) {
    %c0_i32 = arith.constant 0 : i32
    %c0_i32_0 = arith.constant 0 : i32
    return %arg0, %c0_i32 : i32, i32
  }
}

</mosaic_0001>

<bundles_post_ra>
// kernel: tpu_custom_call.1
= control target key start
LH: loop header
LB: loop body
LE: loop exit
PB: predicated region body
PF: predicated region fallthrough
CT: control target
= control target key end

     0   :  { %s3678_s0 = inlined_call_operand.vmem [shape: f32[16,32], index: 0, kind: input, shape index: {}]   ;;  %s3679_s1 = inlined_call_operand.hbm [shape: bf16[2,8,32], index: 1, kind: input, shape index: {}]   ;;  %s3680_s2 = inlined_call_operand.hbm [shape: s32[2,1,8], index: 2, kind: input, shape index: {}]   ;;  %s3681_s3 = inlined_call_operand.hbm [shape: s32[2,1,8], index: 3, kind: input, shape index: {}]   ;;  %s3682_s4 = inlined_call_operand.vmem [shape: f32[16,1], index: 4, kind: input, shape index: {}]   ;;  %s3683_s5 = inlined_call_operand.vmem [shape: bf16[32,96], index: 5, kind: input, shape index: {}]   ;;  %s3684_s6 = inlined_call_operand.hbm [shape: f32[1,96], index: 6, kind: input, shape index: {}]   ;;  %s3685_s7 = inlined_call_operand.vmem [shape: bf16[32,32], index: 7, kind: input, shape index: {}]   ;;  %s3686_s8 = inlined_call_operand.hbm [shape: f32[1,32], index: 8, kind: input, shape index: {}]   ;;  %s3687_s9 = inlined_call_operand.hbm [shape: f32[1,32], index: 9, kind: input, shape index: {}]   ;;  %s3688_s10 = inlined_call_operand.hbm [shape: f32[1,32], index: 10, kind: input, shape index: {}]   ;;  %s3689_s11 = inlined_call_operand.vmem [shape: bf16[32,32], index: 11, kind: input, shape index: {}]   ;;  %s3690_s12 = inlined_call_operand.hbm [shape: f32[1,32], index: 12, kind: input, shape index: {}]   ;;  %s3691_s13 = inlined_call_operand.hbm [shape: bf16[32,64], index: 13, kind: input, shape index: {}]   ;;  %s3692_s14 = inlined_call_operand.hbm [shape: f32[1,64], index: 14, kind: input, shape index: {}]   ;;  %s3693_s15 = inlined_call_operand.hbm [shape: bf16[32,32], index: 15, kind: input, shape index: {}]   ;;  %s3694_s16 = inlined_call_operand.hbm [shape: f32[1,32], index: 16, kind: input, shape index: {}]   ;;  %s3695_s17 = inlined_call_operand.vmem [shape: f32[1,32], index: 17, kind: input, shape index: {}]   ;;  %s3696_s18 = inlined_call_operand.vmem [shape: f32[1,32], index: 18, kind: input, shape index: {}]   ;;  %s3697_s19 = inlined_call_operand.hbm [shape: bf16[32,64], index: 19, kind: input, shape index: {}]   ;;  %s3698_s20 = inlined_call_operand.vmem [shape: f32[1,64], index: 20, kind: input, shape index: {}]   ;;  %s3699_s21 = inlined_call_operand.vmem [shape: bf16[64,32], index: 21, kind: input, shape index: {}]   ;;  %s3700_s22 = inlined_call_operand.vmem [shape: f32[1,32], index: 22, kind: input, shape index: {}]   ;;  %s3701_s23 = inlined_call_operand.vmem [shape: f32[1,32], index: 23, kind: input, shape index: {}]   ;;  %s3702_s24 = inlined_call_operand.vmem [shape: f32[1,32], index: 24, kind: input, shape index: {}]   ;;  %s3703_s25 = inlined_call_operand.hbm [shape: f32[16,32], index: 25, kind: output, shape index: {}]  }
   0x1   :  { %3718 = sst [smem:[#allocation38_spill]] %s3678_s0 }
   0x2   :  { %3719 = sst [smem:[#allocation39_spill]] %s3679_s1 }
   0x3   :  { %3720 = sst [smem:[#allocation40_spill]] %s3680_s2 }
   0x4   :  { %3721 = sst [smem:[#allocation41_spill]] %s3681_s3 }
   0x5   :  { %3722 = sst [smem:[#allocation42_spill]] %s3682_s4 }
   0x6   :  { %3723 = sst [smem:[#allocation43_spill]] %s3683_s5 }
   0x7   :  { %3724 = sst [smem:[#allocation44_spill]] %s3684_s6 }
   0x8   :  { %3725 = sst [smem:[#allocation45_spill]] %s3685_s7 }
   0x9   :  { %3726 = sst [smem:[#allocation46_spill]] %s3686_s8 }
   0xa   :  { %3727 = sst [smem:[#allocation47_spill]] %s3687_s9 }
   0xb   :  { %3728 = sst [smem:[#allocation48_spill]] %s3688_s10 }
   0xc   :  { %3729 = sst [smem:[#allocation49_spill]] %s3690_s12 }
   0xd   :  { %3730 = sst [smem:[#allocation50_spill]] %s3691_s13 }
   0xe   :  { %3731 = sst [smem:[#allocation51_spill]] %s3692_s14 }
   0xf   :  { %3732 = sst [smem:[#allocation52_spill]] %s3693_s15 }
  0x10   :  { %3733 = sst [smem:[#allocation53_spill]] %s3694_s16 }
  0x11   :  { %3734 = sst [smem:[#allocation54_spill]] %s3696_s18 }
  0x12   :  { %3735 = sst [smem:[#allocation55_spill]] %s3698_s20 }
  0x13   :  { %3736 = sst [smem:[#allocation56_spill]] %s3700_s22 }
  0x14   :  { %3737 = sst [smem:[#allocation57_spill]] %s3701_s23 }
  0x15   :  { %3738 = sst [smem:[#allocation58_spill]] %s3702_s24 }
  0x16   :  { %3739 = sst [smem:[#allocation59_spill]] %s3703_s25 }
  0x17   :  { %30 = vsyncpa [#allocation3], 0 }
  0x18   :  { %32 = vsyncpa [#allocation3 + $0x1], 0 }
  0x19   :  { %33 = vsyncpa [#allocation6], 0 }
  0x1a   :  { %35 = vsyncpa [#allocation6 + $0x1], 0 }
  0x1b   :  { %36 = vsyncpa [#allocation9], 0 }
  0x1c   :  { %37 = vsyncpa [#allocation12], 0 }
  0x1d   :  { %38 = vsyncpa [#allocation15], 0 }
  0x1e   :  { %39 = vsyncpa [#allocation18], 0 }
  0x1f   :  { %40 = vsyncpa [#allocation21], 0 }
  0x20   :  { %41 = vsyncpa [#allocation4], 0 }
  0x21   :  { %43 = vsyncpa [#allocation4 + $0x1], 0  ;;  %s3194_s29 = smov 0   ;;  %s3196_s2 = smov 0  }
  0x22   :  { %s3198_s6 = smov 0   ;;  %s3200_s30 = smov 0  }
  0x23 LB: > { %3740 = sst [smem:[#allocation32_spill]] %s3022_s29  ;;  %s3218_s8 = sadd.s32 4294967295, %s3034_s30   ;;  %s3034_s30 = sphi %s3200_s30, %s3792_s30   ;;  %s3030_s6 = sphi %s3198_s6, %s3794_s6   ;;  %s3026_s2 = sphi %s3196_s2, %s3796_s2   ;;  %s3022_s29 = sphi %s3194_s29, %s3795_s29  }
  0x24   : > { %3741 = sst [smem:[#allocation33_spill]] %s3030_s6  ;;  %p2189_p0 = scmp.ge.s32.totalorder %s3034_s30, 1 }
  0x25   : > { %s3742_s26 = sld [smem:[#allocation44_spill]]  ;;  %p3717_p1 = scmp.eq.s32.totalorder %s3218_s8, 0 }
  0x26   : > { %p630_p2 = scmp.lt.s32.totalorder %s3034_s30, 3  ;;  %s3036_s4 = smov [#allocation8]  }
  0x27   : > { %s647_s28 = sshll.u32 %s3036_s4, 4  ;;  %s3744_s0 = sld [smem:[#allocation47_spill]]  ;;  %s648_s28 = int_to_ptr.vmem [resolvable:$true] %s647_s28 }
  0x28   : > { %p3223_p3 = pnand %p2189_p0, %p630_p2  ;;  %s3746_s12 = sld [smem:[#allocation49_spill]] }
  0x29   : > { %s3747_s14 = sld [smem:[#allocation51_spill]]  ;;  %s3038_s22 = smov [#allocation14]  }
  0x2a   : > { %p2373_p5 = pneg %p3223_p3  ;;  %s3039_s24 = smov [#allocation17]  }
  0x2b   : > { %s645_s1 = sshll.u32 %s3742_s26, 4  ;;  %s3037_s26 = smov [#allocation11]   ;;  %s646_s1 = int_to_ptr.hbm [resolvable:$true] %s645_s1 }
  0x2c   : > { %p3235_p6 = pnand %p2373_p5, %p3717_p1  ;;  %s674_s25 = sshll.u32 %s3037_s26, 4  ;;  %s675_s25 = int_to_ptr.vmem [resolvable:$true] %s674_s25 }
  0x2d   : > { %s672_s7 = sshll.u32 %s3744_s0, 4  ;;  %s701_s26 = sshll.u32 %s3038_s22, 4  ;;  %s673_s7 = int_to_ptr.hbm [resolvable:$true] %s672_s7  ;;  %s702_s26 = int_to_ptr.vmem [resolvable:$true] %s701_s26 }
  0x2e   : > { %s699_s23 = sshll.u32 %s3746_s12, 4  ;;  %s3748_s16 = sld [smem:[#allocation53_spill]]  ;;  %s700_s23 = int_to_ptr.hbm [resolvable:$true] %s699_s23 }
  0x2f   : > { %2376 = dma.hbm_to_vmem [thread:$0]  (!%p3235_p6), %s646_s1, 16, %s648_s28, [#allocation9]  }
  0x30   : > { %2382 = dma.hbm_to_vmem [thread:$0]  (!%p3235_p6), %s673_s7, 16, %s675_s25, [#allocation12]  }
  0x31   : > { %s725_s0 = sshll.u32 %s3747_s14, 4  ;;  %s727_s25 = sshll.u32 %s3039_s24, 4  ;;  %s726_s0 = int_to_ptr.hbm [resolvable:$true] %s725_s0  ;;  %s728_s25 = int_to_ptr.vmem [resolvable:$true] %s727_s25 }
  0x32   : > { %2388 = dma.hbm_to_vmem [thread:$0]  (!%p3235_p6), %s700_s23, 16, %s702_s26, [#allocation15]  }
  0x33   : > { %2394 = dma.hbm_to_vmem [thread:$0]  (!%p3235_p6), %s726_s0, 16, %s728_s25, [#allocation18]  }
  0x34   : > { %s751_s7 = sshll.u32 %s3748_s16, 4  ;;  %s3040_s22 = smov [#allocation20]   ;;  %s752_s7 = int_to_ptr.hbm [resolvable:$true] %s751_s7 }
  0x35   : > { %s753_s4 = sshll.u32 %s3040_s22, 4  ;;  %s2188_s23 = sadd.s32 4294967294, %s3034_s30   ;;  %s754_s4 = int_to_ptr.vmem [resolvable:$true] %s753_s4 }
  0x36   : > { %2400 = dma.hbm_to_vmem [thread:$0]  (!%p3235_p6), %s752_s7, 16, %s754_s4, [#allocation21]  }
  0x37   : > { %s3260_s9 = sadd.s32 1, %s3034_s30   ;;  %s82_s5 = sadd.s32 1, %s3030_s6 }
  0x38   : > { %3749 = sst [smem:[#allocation34_spill]] %s3260_s9  ;;  %s79_s26 = ssub.s32 %s3034_s30, %s3260_s9 }
  0x39   : > { %p89_p7 = scmp.ne.s32.totalorder %s3030_s6, %s3026_s2  ;;  %p80_p8 = scmp.eq.s32.totalorder %s79_s26, 0 }
  0x3a   : > { %p90_p9 = scmp.eq.s32.totalorder %s3034_s30, 0  ;;  %p95_p10 = scmp.ne.s32.totalorder %s3026_s2, %s3022_s29 }
  0x3b   : > { %p617_p11 = scmp.eq.s32.totalorder %s3218_s8, 1  ;;  %p623_p2 = scmp.eq.s32.totalorder %s2188_s23, 1 }
  0x3c   : > { %s3272_s0 = scalar_select %p80_p8, %s3030_s6, %s82_s5  }
  0x3d   : > { %p91_p12 = por %p90_p9, %p89_p7  ;;  %p3276_p13 = por %p3717_p1, %p95_p10 }
  0x3e   : > { %3750 = sst [smem:[#allocation35_spill]] %s3272_s0  ;;  %p3280_p0 = por %p617_p11, %p89_p7 }
  0x3f   : > { %p2428_p5 = scmp.lt.s32.totalorder %s3034_s30, 2  ;;  %s3286_s1 = sand.u32 1, %s3030_s6  }
  0x40   : > { %s3752_s25 = scalar_select %p3280_p0, 1, 0 }
  0x41   : > { %p3288_p4 = por %p623_p2, %p95_p10  ;;  %s825_s7 = sand.u32 1, %s3034_s30  }
  0x42   : > { %3753 = sst [smem:[#allocation36_spill]] %s3752_s25  ;;  %p3293_p8 = pnand %p2428_p5, %p91_p12 }
  0x43   : > { %s3754_s28 = scalar_select %p3288_p4, 1, 0 }
  0x44   : > { %s3757_s26 = sld [smem:[#allocation40_spill]]  ;;  %s828_s14 = scalar_lea.vmem [#allocation5], %s3286_s1 }
  0x45   : > { %3755 = sst [smem:[#allocation37_spill]] %s3754_s28  ;;  %s835_s16 = sshll.u32 %s828_s14, 4  ;;  %s836_s16 = int_to_ptr.vmem [resolvable:$true] %s835_s16 }
  0x46   : > { %s3758_s9 = sld [smem:[#allocation46_spill]]  ;;  %s3305_s29 = scalar_lea.sflag [#allocation6], %s825_s7 }
  0x47   : > { %p2708_p9 = pneg %p3293_p8 }
  0x4a   : > { %s831_s12 = scalar_lea.hbm %s3757_s26, %s3034_s30  ;;  %s2711_s14 = scalar_lea.hbm %s3757_s26, 2 }
  0x4b   : > { %s833_s23 = sshll.u32 %s831_s12, 4  ;;  %s834_s23 = int_to_ptr.hbm [resolvable:$true] %s833_s23 }
  0x4c   : > { %s660_s28 = sshll.u32 %s3758_s9, 4  ;;  %s2704_s25 = sshra.s32 %s834_s23, 4  ;;  %s2705_s25 = int_to_ptr.hbm [resolvable:$true] %s2704_s25  ;;  %s661_s28 = int_to_ptr.hbm [resolvable:$true] %s660_s28 }
  0x4d   : > { %s2706_s20 = scalar_lea.hbm %s2705_s25, 1  ;;  %p2712_p12 = scmp.lt.s32.totalorder %s2705_s25, %s3757_s26 }
  0x4e   : > { %p2707_p7 = scmp.ne.s32.totalorder %s2705_s25, %s2706_s20  ;;  %p2713_p2 = scmp.lt.s32.totalorder %s2711_s14, %s2706_s20 }
  0x50   : > { %p2709_p10 = pnand %p2708_p9, %p2707_p7  ;;  %p2714_p5 = por %p2713_p2, %p2712_p12 }
  0x52   : > { %p2710_p11 = pneg %p2709_p10 }
  0x54   : > { %p2715_p1 = pnand %p2714_p5, %p2710_p11 }
  0x56   : > { %2718 = shalt.err (!%p2715_p1)
}
  0x57   : > { %2410 = dma.hbm_to_vmem [thread:$0]  (!%p3293_p8), %s834_s23, 16, %s836_s16, %s3305_s29  }
  0x58   : > { %s3041_s6 = smov [#allocation10]   ;;  %s3759_s10 = sld [smem:[#allocation48_spill]] }
  0x59   : > { %s662_s9 = sshll.u32 %s3041_s6, 4  ;;  %s3760_s13 = sld [smem:[#allocation50_spill]]  ;;  %s663_s9 = int_to_ptr.vmem [resolvable:$true] %s662_s9 }
  0x5a   : > { %2379 = dma.hbm_to_vmem [thread:$0]  (!%p3235_p6), %s661_s28, 16, %s663_s9, [#allocation9]  }
  0x5b   : > { %s3042_s4 = smov [#allocation13]   ;;  %s3043_s16 = smov [#allocation16]  }
  0x5c   : > { %s686_s14 = sshll.u32 %s3042_s4, 4  ;;  %s712_s23 = sshll.u32 %s3043_s16, 4  ;;  %s687_s14 = int_to_ptr.vmem [resolvable:$true] %s686_s14  ;;  %s713_s23 = int_to_ptr.vmem [resolvable:$true] %s712_s23 }
  0x5d   : > { %s3044_s5 = smov 64   ;;  %s3045_s6 = smov 4  }
  0x5e   : > { %s684_s12 = sshll.u32 %s3759_s10, 4  ;;  %s3761_s15 = sld [smem:[#allocation52_spill]]  ;;  %s685_s12 = int_to_ptr.hbm [resolvable:$true] %s684_s12 }
  0x5f   : > { %s710_s25 = sshll.u32 %s3760_s13, 4  ;;  %s3046_s7 = smov [#allocation19]   ;;  %s711_s25 = int_to_ptr.hbm [resolvable:$true] %s710_s25 }
  0x60   : > { %2385 = dma.hbm_to_vmem [thread:$0]  (!%p3235_p6), %s685_s12, 16, %s687_s14, [#allocation12]  }
  0x61   : > { %2391 = dma.hbm_to_vmem [thread:$0]  (!%p3235_p6), %s711_s25, 256, %s713_s23, [#allocation15], %s3044_s5, %s3044_s5, %s3045_s6  }
  0x62   : > { %s738_s18 = sshll.u32 %s3046_s7, 4  ;;  %s768_s4 = sshll.u32 %s3697_s19, 4  ;;  %s739_s18 = int_to_ptr.vmem [resolvable:$true] %s738_s18  ;;  %s769_s4 = int_to_ptr.hbm [resolvable:$true] %s768_s4 }
  0x63   : > { %s3047_s14 = smov [#allocation22]   ;;  %s2201_s25 = sshll.u32 %s3286_s1, 2 }
  0x64   : > { %s736_s0 = sshll.u32 %s3761_s15, 4  ;;  %s770_s16 = sshll.u32 %s3047_s14, 4  ;;  %s737_s0 = int_to_ptr.hbm [resolvable:$true] %s736_s0  ;;  %s771_s16 = int_to_ptr.vmem [resolvable:$true] %s770_s16 }
  0x65   : > { %2397 = dma.hbm_to_vmem [thread:$0]  (!%p3235_p6), %s737_s0, 256, %s739_s18, [#allocation18], %s3044_s5, %s3044_s5, %s3045_s6  }
  0x66   : > { %2403 = dma.hbm_to_vmem [thread:$0]  (!%p3235_p6), %s769_s4, 256, %s771_s16, [#allocation21], %s3044_s5, %s3044_s5, %s3045_s6  }
  0x67   : > { %s2202_s23 = sshll.u32 %s3034_s30, 2  ;;  %s3762_s7 = sld [smem:[#allocation39_spill]] }
  0x68   : > { %s810_s13 = scalar_lea.vmem [#allocation2], %s2201_s25  ;;  %s807_s12 = scalar_lea.sflag [#allocation3], %s3286_s1 }
  0x69   : > { %s818_s15 = sshll.u32 %s810_s13, 4  ;;  %s819_s15 = int_to_ptr.vmem [resolvable:$true] %s818_s15 }
  0x6d   : > { %s814_s10 = scalar_lea.hbm %s3762_s7, %s2202_s23  ;;  %s2891_s6 = scalar_lea.hbm %s3762_s7, 8 }
  0x6e   : > { %s816_s20 = sshll.u32 %s814_s10, 4  ;;  %s817_s20 = int_to_ptr.hbm [resolvable:$true] %s816_s20 }
  0x6f   : > { %s2884_s0 = sshra.s32 %s817_s20, 4  ;;  %s2885_s0 = int_to_ptr.hbm [resolvable:$true] %s2884_s0 }
  0x70   : > { %s2886_s18 = scalar_lea.hbm %s2885_s0, 4  ;;  %p2892_p6 = scmp.lt.s32.totalorder %s2885_s0, %s3762_s7 }
  0x71   : > { %p2887_p1 = scmp.ne.s32.totalorder %s2885_s0, %s2886_s18  ;;  %p2893_p11 = scmp.lt.s32.totalorder %s2891_s6, %s2886_s18 }
  0x73   : > { %p2889_p7 = pnand %p2887_p1, %p2708_p9  ;;  %p2894_p12 = por %p2893_p11, %p2892_p6 }
  0x75   : > { %p2890_p10 = pneg %p2889_p7 }
  0x77   : > { %p2895_p2 = pnand %p2894_p12, %p2890_p10 }
  0x79   : > { %2898 = shalt.err (!%p2895_p2)
}
  0x7a   : > { %2407 = dma.hbm_to_vmem [thread:$0]  (!%p3293_p8), %s817_s20, 64, %s819_s15, %s807_s12  }
  0x7b   : > { %s3763_s16 = sld [smem:[#allocation41_spill]]  ;;  %s845_s23 = scalar_lea.vmem [#allocation7], %s3286_s1 }
  0x7c   : > { %s852_s28 = sshll.u32 %s845_s23, 4  ;;  %s853_s28 = int_to_ptr.vmem [resolvable:$true] %s852_s28 }
  0x81   : > { %s848_s25 = scalar_lea.hbm %s3763_s16, %s3034_s30  ;;  %s2921_s15 = scalar_lea.hbm %s3763_s16, 2 }
  0x82   : > { %s850_s9 = sshll.u32 %s848_s25, 4  ;;  %s851_s9 = int_to_ptr.hbm [resolvable:$true] %s850_s9 }
  0x83   : > { %s2914_s0 = sshra.s32 %s851_s9, 4  ;;  %s2915_s0 = int_to_ptr.hbm [resolvable:$true] %s2914_s0 }
  0x84   : > { %s2916_s18 = scalar_lea.hbm %s2915_s0, 1  ;;  %p2922_p10 = scmp.lt.s32.totalorder %s2915_s0, %s3763_s16 }
  0x85   : > { %p2917_p5 = scmp.ne.s32.totalorder %s2915_s0, %s2916_s18  ;;  %p2923_p6 = scmp.lt.s32.totalorder %s2921_s15, %s2916_s18 }
  0x87   : > { %p2919_p1 = pnand %p2917_p5, %p2708_p9  ;;  %p2924_p11 = por %p2923_p6, %p2922_p10 }
  0x89   : > { %p2920_p7 = pneg %p2919_p1 }
  0x8b   : > { %p2925_p12 = pnand %p2924_p11, %p2920_p7 }
  0x8d   : > { %2928 = shalt.err (!%p2925_p12)
}
  0x8e   : > { %2413 = dma.hbm_to_vmem [thread:$0]  (!%p3293_p8), %s851_s9, 16, %s853_s28, %s3305_s29  }
  0x8f   : > { %868 = sbr.rel (%p3223_p3) target bundleno = 3379 (0xd33), region = 120  ;;  %s3380_s1 = sand.u32 (!%p3223_p3), 1, %s3026_s2  }
  0x90   : > { %s2204_s6 = sshll.u32 (!%p3223_p3), %s3380_s1, 2  ;;  %s871_s4 = scalar_lea.sflag (!%p3223_p3), [#allocation3], %s3380_s1 }
  0x91   : > { %s3384_s14 = scalar_lea.vmem (!%p3223_p3), [#allocation2], %s2204_s6 }
  0x94   : > { %2989 = dma.done.wait (%p3276_p13), %s871_s4, 64  }
  0x95   : > { %2991 = vsyncadd (%p3276_p13), %s871_s4, 4294967232  ;;  %s880_s29 = sand.u32 1, %s3218_s8   ;;  %s883_s22 = scalar_lea.vmem [#allocation5], %s3380_s1 }
  0x96   : > { %s881_s27 = scalar_lea.sflag [#allocation6], %s880_s29 }
  0x97   : > { %2993 = dma.done.wait (%p3276_p13), %s881_s27, 32  }
  0x98   : > { %2995 = vsyncadd (%p3276_p13), %s881_s27, 4294967264  ;;  %s892_s10 = scalar_lea.vmem [#allocation7], %s3380_s1  ;;  %p3764_p3 = scmp.eq.s32.totalorder %s3218_s8, 0 }
  0x9a   : > { %2997 = dma.done.wait (%p3764_p3), [#allocation9], 32   ;;  %p3765_p8 = pmov %p3764_p3 }
  0x9b   : > { %p3766_p9 = pmov %p3764_p3 }
  0x9c   : > { %2999 = vsyncadd (%p3765_p8), [#allocation9], 4294967264 }
  0x9d   : > { %3001 = dma.done.wait (%p3766_p9), [#allocation12], 32   ;;  %p3767_p2 = pmov %p3764_p3 }
  0x9f   : > { %3003 = vsyncadd (%p3767_p2), [#allocation12], 4294967264  ;;  %p3768_p5 = pmov %p3767_p2 }
  0xa0   : > { %p3769_p1 = pmov %p3767_p2 }
  0xa1   : > { %3005 = dma.done.wait (%p3768_p5), [#allocation15], 272  }
  0xa2   : > { %3007 = vsyncadd (%p3769_p1), [#allocation15], 4294967024  ;;  %p3770_p13 = pmov %p3769_p1 }
  0xa3   : > { %p3771_p7 = pmov %p3769_p1 }
  0xa4   : > { %3009 = dma.done.wait (%p3770_p13), [#allocation18], 272  }
  0xa5   : > { %3011 = vsyncadd (%p3771_p7), [#allocation18], 4294967024  ;;  %p3772_p10 = pmov %p3769_p1 }
  0xa6   : > { %p3773_p6 = pmov %p3769_p1 }
  0xa7   : > { %3013 = dma.done.wait (%p3772_p10), [#allocation21], 272  }
  0xa8   : > { %3015 = vsyncadd (%p3773_p6), [#allocation21], 4294967024  ;;  %p1026_p11 = scmp.lt.s32.totalorder %s3218_s8, 1  ;;  %s3774_s28 = sld [smem:[#allocation38_spill]]  ;;  %vm1067_vm0 = vcmask 261120   ;;  %vm1102_vm1 = vcmask 64512   ;;  %v1088_v28 = vlaneseq }
  0xa9   : > { %s3775_s3 = sld [smem:[#allocation43_spill]]  ;;  %v2501_v4 = vld [vmem:[#allocation8] ss:$0 sm:$0xff]  ;;  %s3048_s20 = smov 96   ;;  %v3055_v21 = vmov 0   ;;  %vm1140_vm6 = vcmask 1043456  }
  0xaa   : > { %s3419_s24 = scalar_select %p1026_p11, %s3218_s8, 1  ;;  %2500 = vset.pattern.permute.xlu0 %v3055_v21  ;;  %v1038_v27 = vld [vmem:[%s883_s22] sm:$0x1]  ;;  %v1089_v30 = vshrl.u32 %v1088_v28, 7  ;;  %v1091_v31 = vand.u32 127, %v1088_v28  ;;  %vm1344_vm7 = vcmask 130048  }
  0xab   : > { %s3049_s12 = smov 104   ;;  %s3050_s6 = smov 120   ;;  %vm1087_vm2 = vcmp.eq.s32.totalorder %v1038_v27, 0  ;;  %vm1346_vm8 = vcmask 195584  }
  0xac   : > { %s2216_s13 = sshll.u32 %s3419_s24, 3  ;;  %s3051_s4 = smov 88   ;;  %v1093_v29 = vsel %vm1087_vm2, 1, %v3055_v21  ;;  %vm1092_vm3 = vcmp.gt.s32.totalorder %v1091_v31, %v1089_v30 }
  0xad   : > { %s3052_s29 = smov 80   ;;  %s3053_s27 = smov 72   ;;  %v1094_v32 = vperm.slane %v1093_v29, 0 }
  0xae   : > { %s1029_s9 = scalar_lea.vmem %s3774_s28, %s2216_s13  ;;  %s3054_s25 = smov 112  }
  0xaf   : > { %v2310_v0 = vld [vmem:[%s3775_s3 + $0x8] sm:$0xff]  ;;  %v2309_v1 = vld [vmem:[%s3775_s3] sm:$0xff]  ;;  %vm1095_vm4 = vcmp.eq.s32.totalorder %v1094_v32, 1  ;;  %s3056_s22 = smov 64   ;;  %s3057_s23 = smov 40  }
  0xb0   : > { %v3433_v2 = vld [vmem:[%s1029_s9] sm:$0xff]  ;;  %1077 = vmatpush.bf16.msra.mxu0 %v2310_v0  ;;  %vm3463_vm5 = vmor %vm1095_vm4, %vm1092_vm3  ;;  %s3058_s28 = smov 56   ;;  %s3059_s9 = smov 48   ;;  %vm1898_vm3 = vcmask 523264  }
  0xb1   : > { %v1051_v3 = vpack.c.bf16 %v3433_v2, %v3433_v2  ;;  %s3060_s0 = smov 8   ;;  %s3061_s18 = smov 16  }
  0xb2   : > { %s3062_s5 = smov 24  }
  0xb4   : > { %1078 = vmatpush.bf16.msra.mxu0 %v2309_v1 }
  0xb7   : > { %2226 = vmatmul.msk.bf16.vlgmr.msra.gmra.mxu0 %vm1067_vm0, %v1051_v3 }
 0x134   : > { %v1080_v5 = vpop.f32.mrf.mxu0 }
 0x135   : > { %v1081_v6 = vadd.f32 %v2501_v4, %v1080_v5 }
 0x137   : > { %v1084_v7 = vmul.f32 0.35355338, %v1081_v6  ;;  %v1086_v8 = vpack.c.bf16 %v1081_v6, %v1081_v6 }
 0x139   : > { %v1085_v9 = vpack.c.bf16 %v1084_v7, %v1084_v7  ;;  %v1098_v10 = vunpack.c.l.b16 %v1086_v8 }
 0x13b   : > { %v3438_v11 = vpack.c.b16 %v1098_v10, %v1098_v10  ;;  %v1158_v12 = vunpack.c.l.b16 %v1085_v9 }
 0x13c   : > { %v1082_v13 = vpop.f32.mrf.mxu0 }
 0x13d   : > { %1100 = vrot.lane.b32.xlu0 %v3438_v11, %s3048_s20  ;;  %v1159_v14 = vpack.c.b16 %v1158_v12, %v1158_v12 }
 0x13f   : > { %1274 = vrot.lane.b32.xlu2 %v1159_v14, %s3049_s12  ;;  %1160 = vrot.lane.b32.xlu1 %v1159_v14, %s3050_s6 }
 0x145   : > { %1162 = vrot.lane.b32.xlu0 %v3438_v11, %s3051_s4 }
 0x147   : > { %1219 = vrot.lane.b32.xlu2 %v3438_v11, %s3052_s29  ;;  %1276 = vrot.lane.b32.xlu1 %v3438_v11, %s3053_s27 }
 0x14d   : > { %1217 = vrot.lane.b32.xlu0 %v1159_v14, %s3054_s25 }
 0x199   : > { %v1275_v15 = vpop.permute.xlu2 %1274 }
 0x1a1   : > { %v1220_v16 = vpop.permute.xlu2 %1219 }
 0x1a2   : > { %v1225_v17 = vsel %vm1102_vm1, %v1220_v16, 0 }
 0x1a3   : > { %1234 = vmatpush.bf16.xpose.msrb.mxu0 %v1225_v17 }
 0x1af   : > { %v1101_v18 = vpop.permute.xlu0 %1100 }
 0x1b0   : > { %v1107_v19 = vsel %vm1102_vm1, %v1101_v18, 0 }
 0x1b1   : > { %1116 = vmatpush.bf16.xpose.msra.mxu1 %v1107_v19  ;;  %v1161_v20 = vpop.permute.xlu1 %1160 }
 0x1b7   : > { %v1163_v22 = vpop.permute.xlu0 %1162 }
 0x1b8   : > { %2227 = vmatmul.msk.bf16.vlgmr.msra.gmra.mxu1 %vm1102_vm1, %v1085_v9  ;;  %v1168_v23 = vsel %vm1102_vm1, %v1163_v22, 0 }
 0x1b9   : > { %1177 = vmatpush.bf16.xpose.msra.mxu3 %v1168_v23  ;;  %v1277_v24 = vpop.permute.xlu1 %1276 }
 0x1ba   : > { %v1282_v25 = vsel %vm1102_vm1, %v1277_v24, 0 }
 0x1bf   : > { %v1218_v26 = vpop.permute.xlu0 %1217 }
 0x1c0   : > { %2229 = vmatmul.msk.bf16.vlgmr.msra.gmra.mxu3 %vm1102_vm1, %v1161_v20  ;;  %2231 = vmatmul.msk.bf16.vlgmr.msrb.gmra.mxu0 %vm1102_vm1, %v1218_v26 }
 0x1c1   : > { %1291 = vmatpush.bf16.xpose.msrb.mxu3 %v1282_v25 }
 0x1d0   : > { %2233 = vmatmul.msk.bf16.vlgmr.msrb.gmra.mxu3 %vm1102_vm1, %v1275_v15 }
 0x235   : > { %v1118_v34 = vpop.f32.mrf.mxu1 }
 0x236   : > { %v1122_v35 = vsel %vm3463_vm5, -1e+09, %v1118_v34 }
 0x237   : > { %v1123_v36 = vsel %vm1102_vm1, %v1122_v35, -inf }
 0x238   : > { %1124 = vmax.xlane.f32.xlu1 %v1123_v36 }
 0x23d   : > { %v1120_v37 = vpop.f32.mrf.mxu1  ;;  %v1236_v38 = vpop.f32.mrf.mxu0 }
 0x23e   : > { %v1240_v43 = vsel %vm3463_vm5, -1e+09, %v1236_v38 }
 0x23f   : > { %v1241_v45 = vsel %vm1102_vm1, %v1240_v43, -inf }
 0x243   : > { %v1179_v39 = vpop.f32.mrf.mxu3 }
 0x244   : > { %v1183_v40 = vsel %vm3463_vm5, -1e+09, %v1179_v39 }
 0x245   : > { %v1238_v41 = vpop.f32.mrf.mxu0  ;;  %v1184_v42 = vsel %vm1102_vm1, %v1183_v40, -inf }
 0x246   : > { %1185 = vmax.xlane.f32.xlu2 %v1184_v42 }
 0x24b   : > { %v1181_v44 = vpop.f32.mrf.mxu3 }
 0x24e   : > { %1242 = vmax.xlane.f32.xlu2 %v1241_v45 }
 0x253   : > { %v1293_v46 = vpop.f32.mrf.mxu3 }
 0x254   : > { %v1297_v47 = vsel %vm3463_vm5, -1e+09, %v1293_v46 }
 0x255   : > { %v1298_v48 = vsel %vm1102_vm1, %v1297_v47, -inf }
 0x256   : > { %1299 = vmax.xlane.f32.xlu0 %v1298_v48 }
 0x25b   : > { %v1295_v49 = vpop.f32.mrf.mxu3 }
 0x25c   : > { %v2502_v49 = vld [vmem:[#allocation10] ss:$0 sm:$0xff] }
 0x266   : > { %1135 = vrot.lane.b32.xlu2 %v3438_v11, %s3056_s22  ;;  %s3787_s22 = sld [smem:[#allocation59_spill]] }
 0x26e   : > { %1310 = vrot.lane.b32.xlu2 %v3438_v11, %s3057_s23  ;;  %s3778_s23 = sld [smem:[#allocation45_spill]] }
 0x274   : > { %v2311_v41 = vld [vmem:[%s3778_s23] sm:$0xff] }
 0x2ab   : > { %v1125_v50 = vpop.xlane.xlu1 %1124 }
 0x2ac   : > { %v1126_v51 = vsub.f32 %v1122_v35, %v1125_v50 }
 0x2ae   : > { %v1127_v52 = vmul.f32 1.442695, %v1126_v51 }
 0x2b0   : > { %2514 = vpow2.f32 %v1127_v52 }
 0x2b6   : > { %v2515_v53 = vpop.eup %2514 }
 0x2b7   : > { %v1129_v54 = vsel %vm1102_vm1, %v2515_v53, 0.0 }
 0x2b8   : > { %1130 = vadd.xlane.f32.xlu1 %v1129_v54 }
 0x2b9   : > { %v1186_v55 = vpop.xlane.xlu2 %1185 }
 0x2ba   : > { %v1187_v58 = vsub.f32 %v1183_v40, %v1186_v55  ;;  %v2312_v40 = vld [vmem:[%s3778_s23 + $0x8] sm:$0xff]  ;;  %v3063_v55 = vmov 32.0  }
 0x2bb   : > { %1373 = vmatpush.bf16.msra.mxu0 %v2312_v40  ;;  %v2506_v40 = vld [vmem:[#allocation14] ss:$0 sm:$0xff] }
 0x2bc   : > { %v1188_v60 = vmul.f32 1.442695, %v1187_v58  ;;  %v2315_v58 = vld [vmem:[#allocation16] sm:$0xff] }
 0x2bf   : > { %1374 = vmatpush.bf16.msra.mxu0 %v2311_v41 }
 0x2c1   : > { %v1243_v56 = vpop.xlane.xlu2 %1242 }
 0x2c2   : > { %v1244_v57 = vsub.f32 %v1240_v43, %v1243_v56 }
 0x2c4   : > { %v1245_v59 = vmul.f32 1.442695, %v1244_v57  ;;  %v2316_v57 = vld [vmem:[#allocation16 + $0x8] sm:$0xff] }
 0x2c5   : > { %1498 = vmatpush.bf16.msra.mxu3 %v2316_v57 }
 0x2c6   : > { %2516 = vpow2.f32 %v1245_v59 }
 0x2c7   : > { %2518 = vpow2.f32 %v1188_v60 }
 0x2c9   : > { %v1136_v61 = vpop.permute.xlu2 %1135  ;;  %v1300_v62 = vpop.xlane.xlu0 %1299  ;;  %1499 = vmatpush.bf16.msra.mxu3 %v2315_v58 }
 0x2ca   : > { %v1142_v63 = vsel %vm1140_vm6, %v1136_v61, 0  ;;  %v1301_v1 = vsub.f32 %v1297_v47, %v1300_v62 }
 0x2cb   : > { %1151 = vmatpush.bf16.msra.mxu2 %v1142_v63 }
 0x2cc   : > { %v2517_v0 = vpop.eup %2516  ;;  %v1302_v4 = vmul.f32 1.442695, %v1301_v1 }
 0x2cd   : > { %v1247_v3 = vsel %vm1102_vm1, %v2517_v0, 0.0  ;;  %v2519_v5 = vpop.eup %2518 }
 0x2ce   : > { %1248 = vadd.xlane.f32.xlu0 %v1247_v3  ;;  %2520 = vpow2.f32 %v1302_v4  ;;  %v1190_v6 = vsel %vm1102_vm1, %v2519_v5, 0.0 }
 0x2d1   : > { %1196 = vrot.lane.b32.xlu1 %v3438_v11, %s3058_s28  ;;  %v1311_v15 = vpop.permute.xlu2 %1310  ;;  %s3779_s28 = sld [smem:[#allocation42_spill]] }
 0x2d2   : > { %v1316_v18 = vsel %vm1140_vm6, %v1311_v15, 0 }
 0x2d4   : > { %v2521_v7 = vpop.eup %2520 }
 0x2d5   : > { %v1304_v8 = vsel %vm1102_vm1, %v2521_v7, 0.0 }
 0x2d6   : > { %1191 = vadd.xlane.f32.xlu0 %v1190_v6 }
 0x2de   : > { %1305 = vadd.xlane.f32.xlu0 %v1304_v8  ;;  %v2313_v8 = vld [vmem:[%s3689_s11] sm:$0xff] }
 0x2f2   : > { %1253 = vrot.lane.b32.xlu0 %v3438_v11, %s3059_s9  ;;  %s1033_s9 = scalar_lea.vmem %s3779_s28, %s2216_s13  ;;  %s3783_s13 = sld [smem:[#allocation55_spill]] }
 0x2f3   : > { %v1037_v56 = vld [vmem:[%s1033_s9] sm:$0xff] }
 0x2fa   : > { %1420 = vperm.xlu0 %2500, %v1037_v56  }
 0x32b   : > { %v1131_v9 = vpop.xlane.xlu1 %1130 }
 0x32c   : > { %2522 = vrcp.f32 %v1131_v9 }
 0x332   : > { %v2523_v10 = vpop.eup %2522 }
 0x333   : > { %v1133_v12 = vmul.f32 %v2523_v10, %v2515_v53 }
 0x335   : > { %v1134_v13 = vpack.c.bf16 %v1133_v12, %v1133_v12  ;;  %v2505_v12 = vld [vmem:[#allocation17] ss:$0 sm:$0xff] }
 0x337   : > { %2228 = vmatmul.msk.bf16.vlgmr.msra.gmra.mxu2 %vm1102_vm1, %v1134_v13 }
 0x341   : > { %v1249_v14 = vpop.xlane.xlu0 %1248 }
 0x343   : > { %v1197_v16 = vpop.permute.xlu1 %1196 }
 0x344   : > { %v1202_v17 = vsel %vm1140_vm6, %v1197_v16, 0 }
 0x345   : > { %1211 = vmatpush.bf16.msrb.mxu2 %v1202_v17 }
 0x349   : > { %1325 = vmatpush.bf16.msra.mxu2 %v1316_v18  ;;  %v1192_v19 = vpop.xlane.xlu0 %1191 }
 0x34a   : > { %2524 = vrcp.f32 %v1192_v19 }
 0x350   : > { %v2525_v20 = vpop.eup %2524 }
 0x351   : > { %v1194_v11 = vmul.f32 %v2525_v20, %v2519_v5  ;;  %v1306_v22 = vpop.xlane.xlu0 %1305 }
 0x352   : > { %2526 = vrcp.f32 %v1306_v22 }
 0x353   : > { %v1195_v23 = vpack.c.bf16 %v1194_v11, %v1194_v11  ;;  %2528 = vrcp.f32 %v1249_v14 }
 0x354   : > { %2530 = vrcp.f32 %v3063_v55 }
 0x355   : > { %2230 = vmatmul.msk.bf16.vlgmr.msrb.gmra.mxu2 %vm1102_vm1, %v1195_v23 }
 0x358   : > { %v2527_v24 = vpop.eup %2526 }
 0x359   : > { %v1308_v25 = vmul.f32 %v2527_v24, %v2521_v7  ;;  %v2529_v26 = vpop.eup %2528  ;;  %v2314_v7 = vld [vmem:[%s3689_s11 + $0x8] sm:$0xff] }
 0x35a   : > { %v1251_v27 = vmul.f32 %v2529_v26, %v2517_v0  ;;  %v2531_v59 = vpop.eup %2530 }
 0x35b   : > { %v1309_v28 = vpack.c.bf16 %v1308_v25, %v1308_v25  ;;  %v1385_v60 = vmul.f32 32.0, %v2531_v59  ;;  %vm1389_vm9 = vweird.f32 %v2531_v59 }
 0x35c   : > { %v1252_v31 = vpack.c.bf16 %v1251_v27, %v1251_v27  ;;  %v2503_v27 = vld [vmem:[#allocation11] ss:$0 sm:$0xff] }
 0x35d   : > { %v1386_v61 = vsub.f32 1.0, %v1385_v60 }
 0x35f   : > { %v1387_v62 = vmul.f32 %v2531_v59, %v1386_v61 }
 0x361   : > { %v1388_v63 = vadd.f32 %v2531_v59, %v1387_v62 }
 0x363   : > { %v3517_v0 = vsel %vm1389_vm9, %v2531_v59, %v1388_v63 }
 0x364   : > { %v1254_v29 = vpop.permute.xlu0 %1253 }
 0x365   : > { %2234 = vmatmul.msk.bf16.vlgmr.msra.gmra.mxu2 %vm1102_vm1, %v1309_v28  ;;  %v1259_v30 = vsel %vm1140_vm6, %v1254_v29, 0  ;;  %v2504_v29 = vld [vmem:[#allocation13] ss:$0 sm:$0xff] }
 0x366   : > { %1268 = vmatpush.bf16.msrb.mxu1 %v1259_v30 }
 0x369   : > { %2232 = vmatmul.msk.bf16.vlgmr.msrb.gmra.mxu1 %vm1102_vm1, %v1252_v31 }
 0x36a   : > { %1467 = vmatpush.bf16.msra.mxu1 %v2314_v7 }
 0x36e   : > { %1468 = vmatpush.bf16.msra.mxu1 %v2313_v8 }
 0x3ba   : > { %v1153_v32 = vpop.f32.mrf.mxu2 }
 0x3c2   : > { %v1155_v33 = vpop.f32.mrf.mxu2 }
 0x3d8   : > { %v1213_v34 = vpop.f32.mrf.mxu2 }
 0x3d9   : > { %1332 = vrot.lane.b32.xlu1 %v1213_v34, %s3060_s0 }
 0x3e0   : > { %v1215_v35 = vpop.f32.mrf.mxu2 }
 0x3e6   : > { %v1270_v36 = vpop.f32.mrf.mxu1 }
 0x3e7   : > { %1336 = vrot.lane.b32.xlu2 %v1270_v36, %s3061_s18 }
 0x3e8   : > { %v1327_v37 = vpop.f32.mrf.mxu2 }
 0x3e9   : > { %1340 = vrot.lane.b32.xlu1 %v1327_v37, %s3062_s5 }
 0x3ee   : > { %v1272_v38 = vpop.f32.mrf.mxu1 }
 0x3f0   : > { %v1329_v39 = vpop.f32.mrf.mxu2 }
 0x441   : > { %v1337_v44 = vpop.permute.xlu2 %1336 }
 0x44b   : > { %v1333_v42 = vpop.permute.xlu1 %1332 }
 0x44c   : > { %v1343_v43 = vsel %vm1102_vm1, %v1153_v32, %v1333_v42  ;;  %v3535_v32 = vpop.permute.xlu0 %1420 }
 0x44d   : > { %v1345_v46 = vsel %vm1344_vm7, %v1343_v43, %v1337_v44 }
 0x45b   : > { %v1341_v45 = vpop.permute.xlu1 %1340 }
 0x45c   : > { %v1347_v47 = vsel %vm1346_vm8, %v1345_v46, %v1341_v45 }
 0x45d   : > { %v1348_v48 = vpack.c.bf16 %v1347_v47, %v1347_v47 }
 0x45f   : > { %2243 = vmatmul.msk.bf16.vlgmr.msra.gmra.mxu0 %vm1067_vm0, %v1348_v48  ;;  %v1424_v48 = vld [vmem:[%s892_s10] sm:$0x1]  ;;  %s3784_s10 = sld [smem:[#allocation56_spill]] }
 0x460   : > { %vm1508_vm13 = vcmp.eq.s32.totalorder %v1424_v48, 0 }
 0x4dc   : > { %v1376_v50 = vpop.f32.mrf.mxu0 }
 0x4dd   : > { %v1377_v51 = vadd.f32 %v2502_v49, %v1376_v50  ;;  %v1528_v50 = vsel %vm1508_vm13, 1, %v3055_v21 }
 0x4df   : > { %v1380_v52 = vadd.f32 %v1377_v51, %v3433_v2  ;;  %v1036_v2 = vld [vmem:[%s3384_s14] sm:$0xf]  ;;  %v1529_v51 = vperm.slane %v1528_v50, 0  ;;  %s1949_s14 = scalar_lea.sflag [#allocation4], %s3380_s1 }
 0x4e0   : > { %2261 = vmatmul.msk.bf16.vlgmr.msra.gmra.mxu3 %vm1067_vm0, %v1036_v2 }
 0x4e1   : > { %v1381_v53 = vsel %vm1067_vm0, %v1380_v52, 0.0  ;;  %vm3556_vm14 = vcmp.eq.s32.totalorder %v1529_v51, 1 }
 0x4e2   : > { %1382 = vadd.xlane.f32.xlu2 %v1381_v53 }
 0x4e4   : > { %v1378_v54 = vpop.f32.mrf.mxu0 }
 0x555   : > { %v1383_v1 = vpop.xlane.xlu2 %1382 }
 0x556   : > { %v1391_v3 = vmul.f32 %v3517_v0, %v1383_v1 }
 0x558   : > { %v1392_v4 = vsub.f32 %v1380_v52, %v1391_v3 }
 0x55a   : > { %v1393_v5 = vmul.f32 %v1392_v4, %v1392_v4 }
 0x55c   : > { %v1394_v6 = vsel %vm1067_vm0, %v1393_v5, 0.0 }
 0x55d   : > { %1395 = vadd.xlane.f32.xlu1 %v1394_v6 }
 0x563   : > { %v1501_v13 = vpop.f32.mrf.mxu3 }
 0x564   : > { %v1502_v15 = vadd.f32 %v2505_v12, %v1501_v13 }
 0x566   : > { %v1507_v16 = vpack.c.bf16 %v1502_v15, %v1502_v15 }
 0x568   : > { %v1513_v17 = vsel %vm1102_vm1, %v1507_v16, 0  ;;  %v1545_v18 = vunpack.c.l.b16 %v1507_v16 }
 0x569   : > { %1522 = vmatpush.bf16.xpose.msrb.mxu2 %v1513_v17 }
 0x56a   : > { %v3529_v19 = vpack.c.b16 %v1545_v18, %v1545_v18 }
 0x56b   : > { %v1503_v20 = vpop.f32.mrf.mxu3 }
 0x56c   : > { %1573 = vrot.lane.b32.xlu0 %v3529_v19, %s3050_s6  ;;  %1687 = vrot.lane.b32.xlu2 %v3529_v19, %s3049_s12 }
 0x5c6   : > { %v1688_v37 = vpop.permute.xlu2 %1687 }
 0x5c7   : > { %v1693_v39 = vsel %vm1102_vm1, %v1688_v37, 0 }
 0x5d0   : > { %v1396_v9 = vpop.xlane.xlu1 %1395 }
 0x5d1   : > { %v1397_v10 = vmul.f32 %v1396_v9, %v3517_v0 }
 0x5d3   : > { %v1398_v14 = vadd.f32 1e-05, %v1397_v10 }
 0x5d5   : > { %2532 = vrsqrt.f32 %v1398_v14  ;;  %vm1405_vm11 = vweird.f32 %v1398_v14 }
 0x5db   : > { %v2533_v11 = vpop.eup %2532 }
 0x5dc   : > { %v1400_v22 = vmul.f32 %v2533_v11, %v1398_v14  ;;  %vm1406_vm10 = vweird.f32 %v2533_v11 }
 0x5dd   : > { %vm1407_vm12 = vmor %vm1405_vm11, %vm1406_vm10 }
 0x5de   : > { %v1401_v23 = vmul.f32 %v2533_v11, %v1400_v22  ;;  %v1574_v36 = vpop.permute.xlu0 %1573 }
 0x5df   : > { %v1579_v38 = vsel %vm1102_vm1, %v1574_v36, 0 }
 0x5e0   : > { %v1402_v24 = vmul.f32 0.5, %v1401_v23  ;;  %1588 = vmatpush.bf16.xpose.msrb.mxu1 %v1579_v38 }
 0x5e2   : > { %v1403_v25 = vsub.f32 1.5, %v1402_v24 }
 0x5e4   : > { %v1404_v26 = vmul.f32 %v2533_v11, %v1403_v25 }
 0x5e6   : > { %v1408_v28 = vsel %vm1407_vm12, %v2533_v11, %v1404_v26 }
 0x5e7   : > { %v1409_v30 = vmul.f32 %v1408_v28, %v1392_v4 }
 0x5e9   : > { %v1413_v31 = vmul.f32 %v2503_v27, %v1409_v30 }
 0x5eb   : > { %v1417_v33 = vadd.f32 %v2504_v29, %v1413_v31 }
 0x5ed   : > { %v3538_v34 = vmul.f32 %v3535_v32, %v1417_v33 }
 0x5ef   : > { %v1442_v35 = vpack.c.bf16 %v3538_v34, %v3538_v34 }
 0x5f1   : > { %2252 = vmatmul.msk.bf16.vlgmr.msra.gmra.mxu1 %vm1067_vm0, %v1442_v35 }
 0x5f2   : > { %1702 = vmatpush.bf16.xpose.msra.mxu1 %v1693_v39 }
 0x66e   : > { %v1470_v41 = vpop.f32.mrf.mxu1 }
 0x66f   : > { %v1471_v42 = vadd.f32 %v2506_v40, %v1470_v41 }
 0x671   : > { %v1505_v43 = vmul.f32 0.35355338, %v1471_v42 }
 0x673   : > { %v1506_v44 = vpack.c.bf16 %v1505_v43, %v1505_v43 }
 0x675   : > { %v1569_v45 = vunpack.c.l.b16 %v1506_v44  ;;  %2262 = vmatmul.msk.bf16.vlgmr.msrb.gmra.mxu2 %vm1102_vm1, %v1506_v44 }
 0x676   : > { %v1472_v46 = vpop.f32.mrf.mxu1 }
 0x677   : > { %v1570_v47 = vpack.c.b16 %v1569_v45, %v1569_v45 }
 0x679   : > { %1628 = vrot.lane.b32.xlu1 %v1570_v47, %s3054_s25  ;;  %1571 = vrot.lane.b32.xlu0 %v1570_v47, %s3050_s6 }
 0x681   : > { %1630 = vrot.lane.b32.xlu0 %v3529_v19, %s3054_s25 }
 0x689   : > { %1685 = vrot.lane.b32.xlu0 %v1570_v47, %s3049_s12  ;;  %s2306_s12 = sshll.u32 %s3218_s8, 3 }
 0x68a   : > { %s1959_s9 = scalar_lea.hbm %s3787_s22, %s2306_s12 }
 0x6eb   : > { %v1572_v49 = vpop.permute.xlu0 %1571  ;;  %v1629_v58 = vpop.permute.xlu1 %1628 }
 0x6ec   : > { %2264 = vmatmul.msk.bf16.vlgmr.msrb.gmra.mxu1 %vm1102_vm1, %v1572_v49 }
 0x6f3   : > { %v1631_v52 = vpop.permute.xlu0 %1630 }
 0x6f4   : > { %v1636_v53 = vsel %vm1102_vm1, %v1631_v52, 0 }
 0x6f5   : > { %1645 = vmatpush.bf16.xpose.msra.mxu2 %v1636_v53 }
 0x6f8   : > { %v1524_v55 = vpop.f32.mrf.mxu2 }
 0x6f9   : > { %v1531_v56 = vsel %vm3556_vm14, -1e+09, %v1524_v55 }
 0x6fa   : > { %v1532_v57 = vsel %vm1102_vm1, %v1531_v56, -inf }
 0x6fb   : > { %v1686_v59 = vpop.permute.xlu0 %1685  ;;  %1533 = vmax.xlane.f32.xlu2 %v1532_v57 }
 0x6fc   : > { %2266 = vmatmul.msk.bf16.vlgmr.msra.gmra.mxu2 %vm1102_vm1, %v1629_v58  ;;  %2268 = vmatmul.msk.bf16.vlgmr.msra.gmra.mxu1 %vm1102_vm1, %v1686_v59 }
 0x700   : > { %v1526_v21 = vpop.f32.mrf.mxu2 }
 0x769   : > { %v1590_v60 = vpop.f32.mrf.mxu1 }
 0x76a   : > { %v1594_v2 = vsel %vm3556_vm14, -1e+09, %v1590_v60 }
 0x76b   : > { %v1595_v61 = vsel %vm1102_vm1, %v1594_v2, -inf }
 0x76c   : > { %1596 = vmax.xlane.f32.xlu0 %v1595_v61 }
 0x76e   : > { %v1534_v62 = vpop.xlane.xlu2 %1533 }
 0x76f   : > { %v1535_v63 = vsub.f32 %v1531_v56, %v1534_v62  ;;  %v2318_v62 = vld [vmem:[#allocation19 + $0x8] sm:$0xff] }
 0x770   : > { %1782 = vmatpush.bf16.msrb.mxu2 %v2318_v62 }
 0x771   : > { %v1536_v1 = vmul.f32 1.442695, %v1535_v63  ;;  %v1592_v3 = vpop.f32.mrf.mxu1  ;;  %v2317_v63 = vld [vmem:[#allocation19] sm:$0xff] }
 0x773   : > { %2534 = vpow2.f32 %v1536_v1 }
 0x774   : > { %1783 = vmatpush.bf16.msrb.mxu2 %v2317_v63 }
 0x779   : > { %v2535_v4 = vpop.eup %2534  ;;  %v1704_v5 = vpop.f32.mrf.mxu1 }
 0x77a   : > { %v1708_v6 = vsel %vm3556_vm14, -1e+09, %v1704_v5  ;;  %v1538_v7 = vsel %vm1102_vm1, %v2535_v4, 0.0 }
 0x77b   : > { %1539 = vadd.xlane.f32.xlu2 %v1538_v7  ;;  %v1709_v8 = vsel %vm1102_vm1, %v1708_v6, -inf }
 0x77c   : > { %1710 = vmax.xlane.f32.xlu1 %v1709_v8 }
 0x77f   : > { %v1647_v9 = vpop.f32.mrf.mxu2 }
 0x780   : > { %v1651_v10 = vsel %vm3556_vm14, -1e+09, %v1647_v9  ;;  %v2507_v9 = vld [vmem:[#allocation20] ss:$0 sm:$0xff] }
 0x781   : > { %v1706_v12 = vpop.f32.mrf.mxu1  ;;  %v1652_v13 = vsel %vm1102_vm1, %v1651_v10, -inf }
 0x782   : > { %1653 = vmax.xlane.f32.xlu0 %v1652_v13 }
 0x787   : > { %v1649_v14 = vpop.f32.mrf.mxu2 }
 0x795   : > { %1547 = vrot.lane.b32.xlu1 %v3529_v19, %s3048_s20  ;;  %s2215_s20 = sshll.u32 %s3380_s1, 3 }
 0x796   : > { %1607 = vrot.lane.b32.xlu0 %v3529_v19, %s3051_s4  ;;  %s1025_s24 = scalar_lea.vmem [#allocation23], %s2215_s20  ;;  %s2964_s20 = scalar_lea.hbm %s3787_s22, 16 }
 0x797   : > { %s1961_s8 = sshll.u32 %s1025_s24, 4  ;;  %s1962_s8 = int_to_ptr.vmem [resolvable:$true] %s1961_s8 }
 0x7df   : > { %v1597_v15 = vpop.xlane.xlu0 %1596 }
 0x7e0   : > { %v1598_v16 = vsub.f32 %v1594_v2, %v1597_v15 }
 0x7e2   : > { %v1599_v17 = vmul.f32 1.442695, %v1598_v16 }
 0x7e4   : > { %2536 = vpow2.f32 %v1599_v17 }
 0x7ea   : > { %v2537_v18 = vpop.eup %2536 }
 0x7eb   : > { %v1601_v20 = vsel %vm1102_vm1, %v2537_v18, 0.0 }
 0x7ec   : > { %1602 = vadd.xlane.f32.xlu0 %v1601_v20 }
 0x7ee   : > { %v1540_v26 = vpop.xlane.xlu2 %1539 }
 0x7ef   : > { %v1711_v11 = vpop.xlane.xlu1 %1710 }
 0x7f0   : > { %v1712_v24 = vsub.f32 %v1708_v6, %v1711_v11 }
 0x7f2   : > { %v1713_v27 = vmul.f32 1.442695, %v1712_v24 }
 0x7f5   : > { %v1654_v22 = vpop.xlane.xlu0 %1653 }
 0x7f6   : > { %v1655_v23 = vsub.f32 %v1651_v10, %v1654_v22  ;;  %v2320_v22 = vld [vmem:[#allocation22 + $0x8] sm:$0xff] }
 0x7f8   : > { %v1656_v25 = vmul.f32 1.442695, %v1655_v23  ;;  %v2319_v23 = vld [vmem:[#allocation22] sm:$0xff] }
 0x7fa   : > { %2538 = vpow2.f32 %v1656_v25 }
 0x7fb   : > { %2540 = vrcp.f32 %v1540_v26 }
 0x7fc   : > { %2542 = vpow2.f32 %v1713_v27  ;;  %v2323_v27 = vld [vmem:[%s3699_s21 + $0x10] sm:$0xff] }
 0x800   : > { %v2539_v28 = vpop.eup %2538  ;;  %1664 = vrot.lane.b32.xlu0 %v3529_v19, %s3052_s29  ;;  %s3785_s29 = sld [smem:[#allocation57_spill]] }
 0x801   : > { %v1658_v29 = vsel %vm1102_vm1, %v2539_v28, 0.0  ;;  %v2541_v30 = vpop.eup %2540 }
 0x802   : > { %1659 = vadd.xlane.f32.xlu2 %v1658_v29  ;;  %v2543_v31 = vpop.eup %2542  ;;  %v1542_v33 = vmul.f32 %v2541_v30, %v2535_v4 }
 0x803   : > { %v1715_v39 = vsel %vm1102_vm1, %v2543_v31, 0.0 }
 0x804   : > { %v1543_v40 = vpack.c.bf16 %v1542_v33, %v1542_v33 }
 0x807   : > { %v1548_v35 = vpop.permute.xlu1 %1547 }
 0x808   : > { %v1553_v36 = vsel %vm1140_vm6, %v1548_v35, 0  ;;  %v1608_v37 = vpop.permute.xlu0 %1607 }
 0x809   : > { %v1613_v38 = vsel %vm1140_vm6, %v1608_v37, 0  ;;  %1562 = vmatpush.bf16.msrb.mxu0 %v1553_v36  ;;  %v2508_v36 = vld [vmem:[%s3695_s17] ss:$0 sm:$0xff] }
 0x80a   : > { %1716 = vadd.xlane.f32.xlu2 %v1715_v39  ;;  %1622 = vmatpush.bf16.msrb.mxu3 %v1613_v38 }
 0x80c   : > { %2263 = vmatmul.msk.bf16.vlgmr.msrb.gmra.mxu0 %vm1102_vm1, %v1543_v40 }
 0x822   : > { %1721 = vrot.lane.b32.xlu2 %v3529_v19, %s3053_s27 }
 0x85f   : > { %v1603_v41 = vpop.xlane.xlu0 %1602 }
 0x860   : > { %2544 = vrcp.f32 %v1603_v41 }
 0x866   : > { %v2545_v42 = vpop.eup %2544 }
 0x867   : > { %v1605_v43 = vmul.f32 %v2545_v42, %v2537_v18 }
 0x869   : > { %v1606_v44 = vpack.c.bf16 %v1605_v43, %v1605_v43 }
 0x86b   : > { %2265 = vmatmul.msk.bf16.vlgmr.msrb.gmra.mxu3 %vm1102_vm1, %v1606_v44  ;;  %v2322_v44 = vld [vmem:[%s3699_s21 + $0x8] sm:$0xff] }
 0x872   : > { %v1665_v45 = vpop.permute.xlu0 %1664 }
 0x873   : > { %v1670_v46 = vsel %vm1140_vm6, %v1665_v45, 0  ;;  %v2321_v45 = vld [vmem:[%s3699_s21] sm:$0xff] }
 0x874   : > { %1679 = vmatpush.bf16.msra.mxu0 %v1670_v46  ;;  %v2510_v46 = vld [vmem:[%s3783_s13] ss:$0 sm:$0xff]  ;;  %s1963_s13 = sshll.u32 %s1959_s9, 4  ;;  %s1964_s13 = int_to_ptr.hbm [resolvable:$true] %s1963_s13 }
 0x875   : > { %v1660_v47 = vpop.xlane.xlu2 %1659  ;;  %s2958_s15 = sshra.s32 %s1964_s13, 4  ;;  %s2959_s15 = int_to_ptr.hbm [resolvable:$true] %s2958_s15 }
 0x876   : > { %2546 = vrcp.f32 %v1660_v47  ;;  %p2965_p9 = scmp.lt.s32.totalorder %s2959_s15, %s3787_s22 }
 0x878   : > { %1862 = vmatpush.bf16.msrb.mxu0 %v2320_v22 }
 0x87c   : > { %v2547_v48 = vpop.eup %2546  ;;  %1863 = vmatpush.bf16.msrb.mxu0 %v2319_v23 }
 0x87d   : > { %v1662_v49 = vmul.f32 %v2547_v48, %v2539_v28  ;;  %v1717_v50 = vpop.xlane.xlu2 %1716 }
 0x87e   : > { %2548 = vrcp.f32 %v1717_v50 }
 0x87f   : > { %v1663_v51 = vpack.c.bf16 %v1662_v49, %v1662_v49 }
 0x881   : > { %2267 = vmatmul.msk.bf16.vlgmr.msra.gmra.mxu0 %vm1102_vm1, %v1663_v51 }
 0x884   : > { %v2549_v19 = vpop.eup %2548 }
 0x885   : > { %v1719_v52 = vmul.f32 %v2549_v19, %v2543_v31  ;;  %v1722_v53 = vpop.permute.xlu2 %1721  ;;  %v2511_v19 = vld [vmem:[%s3784_s10] ss:$0 sm:$0xff]  ;;  %s2960_s10 = scalar_lea.hbm %s2959_s15, 8 }
 0x886   : > { %v1727_v54 = vsel %vm1140_vm6, %v1722_v53, 0  ;;  %p2961_p12 = scmp.ne.s32.totalorder %s2959_s15, %s2960_s10  ;;  %p2966_p2 = scmp.lt.s32.totalorder %s2964_s20, %s2960_s10 }
 0x887   : > { %v1720_v55 = vpack.c.bf16 %v1719_v52, %v1719_v52  ;;  %1736 = vmatpush.bf16.msra.mxu3 %v1727_v54 }
 0x888   : > { %p2962_p3 = pnand %p2961_p12, %p3280_p0  ;;  %p2967_p5 = por %p2966_p2, %p2965_p9 }
 0x889   : > { %v1564_v56 = vpop.f32.mrf.mxu0 }
 0x88a   : > { %2269 = vmatmul.msk.bf16.vlgmr.msra.gmra.mxu3 %vm1102_vm1, %v1720_v55  ;;  %p2963_p8 = pneg %p2962_p3 }
 0x88c   : > { %p2968_p1 = pnand %p2967_p5, %p2963_p8 }
 0x891   : > { %v1566_v57 = vpop.f32.mrf.mxu0 }
 0x8ee   : > { %v1624_v58 = vpop.f32.mrf.mxu3 }
 0x8ef   : > { %1743 = vrot.lane.b32.xlu1 %v1624_v58, %s3060_s0  ;;  %s3782_s0 = sld [smem:[#allocation54_spill]] }
 0x8f5   : > { %v2509_v38 = vld [vmem:[%s3782_s0] ss:$0 sm:$0xff]  ;;  %s3786_s0 = sld [smem:[#allocation58_spill]] }
 0x8f6   : > { %v1626_v59 = vpop.f32.mrf.mxu3 }
 0x8fe   : > { %v1681_v21 = vpop.f32.mrf.mxu0 }
 0x8ff   : > { %1747 = vrot.lane.b32.xlu0 %v1681_v21, %s3061_s18 }
 0x906   : > { %v1683_v60 = vpop.f32.mrf.mxu0 }
 0x90d   : > { %v1738_v2 = vpop.f32.mrf.mxu3 }
 0x90e   : > { %1751 = vrot.lane.b32.xlu1 %v1738_v2, %s3062_s5 }
 0x915   : > { %v1740_v61 = vpop.f32.mrf.mxu3 }
 0x961   : > { %v1744_v1 = vpop.permute.xlu1 %1743 }
 0x962   : > { %v1754_v4 = vsel %vm1102_vm1, %v1564_v56, %v1744_v1 }
 0x971   : > { %v1748_v3 = vpop.permute.xlu0 %1747 }
 0x972   : > { %v1755_v5 = vsel %vm1344_vm7, %v1754_v4, %v1748_v3 }
 0x980   : > { %v1752_v6 = vpop.permute.xlu1 %1751 }
 0x981   : > { %v1756_v7 = vsel %vm1346_vm8, %v1755_v5, %v1752_v6 }
 0x982   : > { %v1757_v8 = vpack.c.bf16 %v1756_v7, %v1756_v7  ;;  %v2512_v7 = vld [vmem:[%s3785_s29] ss:$0 sm:$0xff] }
 0x984   : > { %2278 = vmatmul.msk.bf16.vlgmr.msrb.gmra.mxu2 %vm1067_vm0, %v1757_v8 }
 0xa07   : > { %v1785_v10 = vpop.f32.mrf.mxu2 }
 0xa08   : > { %v1786_v12 = vadd.f32 %v2507_v9, %v1785_v10 }
 0xa0a   : > { %v1789_v13 = vadd.f32 %v1786_v12, %v3538_v34  ;;  %v2324_v34 = vld [vmem:[%s3699_s21 + $0x18] sm:$0xff] }
 0xa0b   : > { %1906 = vmatpush.bf16.msrb.mxu1 %v2324_v34 }
 0xa0c   : > { %v1790_v14 = vsel %vm1067_vm0, %v1789_v13, 0.0 }
 0xa0d   : > { %1791 = vadd.xlane.f32.xlu0 %v1790_v14 }
 0xa0f   : > { %v1787_v15 = vpop.f32.mrf.mxu2  ;;  %1907 = vmatpush.bf16.msrb.mxu1 %v2323_v27 }
 0xa13   : > { %1908 = vmatpush.bf16.msrb.mxu1 %v2322_v44 }
 0xa17   : > { %1909 = vmatpush.bf16.msrb.mxu1 %v2321_v45 }
 0xa80   : > { %v1792_v16 = vpop.xlane.xlu0 %1791 }
 0xa81   : > { %v1793_v17 = vmul.f32 %v1792_v16, %v3517_v0 }
 0xa83   : > { %v1794_v18 = vsub.f32 %v1789_v13, %v1793_v17 }
 0xa85   : > { %v1795_v20 = vmul.f32 %v1794_v18, %v1794_v18 }
 0xa87   : > { %v1796_v11 = vsel %vm1067_vm0, %v1795_v20, 0.0 }
 0xa88   : > { %1797 = vadd.xlane.f32.xlu1 %v1796_v11 }
 0xafb   : > { %v1798_v24 = vpop.xlane.xlu1 %1797 }
 0xafc   : > { %v1799_v25 = vmul.f32 %v1798_v24, %v3517_v0 }
 0xafe   : > { %v1800_v26 = vadd.f32 1e-05, %v1799_v25 }
 0xb00   : > { %2550 = vrsqrt.f32 %v1800_v26  ;;  %vm1807_vm1 = vweird.f32 %v1800_v26 }
 0xb06   : > { %v2551_v28 = vpop.eup %2550 }
 0xb07   : > { %v1802_v29 = vmul.f32 %v2551_v28, %v1800_v26  ;;  %vm1808_vm15 = vweird.f32 %v2551_v28 }
 0xb08   : > { %vm1809_vm2 = vmor %vm1807_vm1, %vm1808_vm15 }
 0xb09   : > { %v1803_v30 = vmul.f32 %v2551_v28, %v1802_v29 }
 0xb0b   : > { %v1804_v31 = vmul.f32 0.5, %v1803_v30 }
 0xb0d   : > { %v1805_v33 = vsub.f32 1.5, %v1804_v31 }
 0xb0f   : > { %v1806_v35 = vmul.f32 %v2551_v28, %v1805_v33 }
 0xb11   : > { %v1810_v37 = vsel %vm1809_vm2, %v2551_v28, %v1806_v35 }
 0xb12   : > { %v1811_v39 = vmul.f32 %v1810_v37, %v1794_v18 }
 0xb14   : > { %v1815_v40 = vmul.f32 %v2508_v36, %v1811_v39 }
 0xb16   : > { %v1819_v41 = vadd.f32 %v2509_v38, %v1815_v40 }
 0xb18   : > { %v1820_v42 = vmul.f32 %v1819_v41, %v3535_v32 }
 0xb1a   : > { %v1837_v43 = vpack.c.bf16 %v1820_v42, %v1820_v42 }
 0xb1c   : > { %2287 = vmatmul.msk.bf16.vlgmr.msrb.gmra.mxu0 %vm1067_vm0, %v1837_v43 }
 0xb99   : > { %v1865_v47 = vpop.f32.mrf.mxu0 }
 0xb9a   : > { %v1866_v48 = vadd.f32 %v2510_v46, %v1865_v47 }
 0xb9c   : > { %v1869_v49 = vmax.f32 %v1866_v48, 0.0 }
 0xb9e   : > { %v1870_v50 = vpack.c.bf16 %v1869_v49, %v1869_v49 }
 0xba0   : > { %2304 = vmatmul.msk.bf16.vlgmr.msrb.gmra.mxu1 %vm1898_vm3, %v1870_v50 }
 0xba1   : > { %v1867_v51 = vpop.f32.mrf.mxu0 }
 0xc1d   : > { %v1911_v52 = vpop.f32.mrf.mxu1 }
 0xc1e   : > { %v1912_v53 = vadd.f32 %v2511_v19, %v1911_v52 }
 0xc20   : > { %v1915_v54 = vadd.f32 %v1912_v53, %v1820_v42 }
 0xc22   : > { %v1916_v55 = vsel %vm1067_vm0, %v1915_v54, 0.0 }
 0xc23   : > { %1917 = vadd.xlane.f32.xlu2 %v1916_v55 }
 0xc25   : > { %v1913_v56 = vpop.f32.mrf.mxu1 }
 0xc96   : > { %v1918_v57 = vpop.xlane.xlu2 %1917 }
 0xc97   : > { %v1919_v58 = vmul.f32 %v1918_v57, %v3517_v0 }
 0xc99   : > { %v1920_v59 = vsub.f32 %v1915_v54, %v1919_v58 }
 0xc9b   : > { %v1921_v21 = vmul.f32 %v1920_v59, %v1920_v59 }
 0xc9d   : > { %v1922_v60 = vsel %vm1067_vm0, %v1921_v21, 0.0 }
 0xc9e   : > { %1923 = vadd.xlane.f32.xlu0 %v1922_v60 }
 0xd11   : > { %v1924_v2 = vpop.xlane.xlu0 %1923 }
 0xd12   : > { %v1925_v61 = vmul.f32 %v1924_v2, %v3517_v0  ;;  %v2513_v0 = vld [vmem:[%s3786_s0] ss:$0 sm:$0xff] }
 0xd14   : > { %v1926_v62 = vadd.f32 1e-05, %v1925_v61 }
 0xd16   : > { %2552 = vrsqrt.f32 %v1926_v62  ;;  %vm1933_vm5 = vweird.f32 %v1926_v62 }
 0xd1c   : > { %v2553_v63 = vpop.eup %2552 }
 0xd1d   : > { %v1928_v1 = vmul.f32 %v2553_v63, %v1926_v62  ;;  %vm1934_vm4 = vweird.f32 %v2553_v63 }
 0xd1e   : > { %vm1935_vm6 = vmor %vm1933_vm5, %vm1934_vm4 }
 0xd1f   : > { %v1929_v3 = vmul.f32 %v2553_v63, %v1928_v1 }
 0xd21   : > { %v1930_v4 = vmul.f32 0.5, %v1929_v3 }
 0xd23   : > { %v1931_v5 = vsub.f32 1.5, %v1930_v4 }
 0xd25   : > { %v1932_v6 = vmul.f32 %v2553_v63, %v1931_v5 }
 0xd27   : > { %v1936_v8 = vsel %vm1935_vm6, %v2553_v63, %v1932_v6 }
 0xd28   : > { %v1937_v9 = vmul.f32 %v1936_v8, %v1920_v59 }
 0xd2a   : > { %v1941_v10 = vmul.f32 %v2512_v7, %v1937_v9 }
 0xd2c   : > { %v1945_v12 = vadd.f32 %v2513_v0, %v1941_v10 }
 0xd2e   : > { %v1946_v13 = vmul.f32 %v1945_v12, %v3535_v32 }
 0xd30   : > { %1947 = vst.msk [vmem:[%s1025_s24] sm:$0xff] %vm1067_vm0, %v1946_v13 }
 0xd31   : > { %2971 = shalt.err (!%p2968_p1)
}
 0xd32   : > { %2371 = dma.vmem_to_hbm [thread:$0]  (%p3280_p0), %s1962_s8, 128, %s1964_s13, %s1949_s14  }
 0xd33 PF: > { %s3789_s1 = sld [smem:[#allocation32_spill]]  ;;  %p3791_p13 = scmp.ge.s32.totalorder %s3034_s30, 2 }
 0xd35   : > { %p2415_p7 = pnand %p3791_p13, %p3288_p4 }
 0xd37   : > { %p2416_p10 = pneg %p2415_p7 }
 0xd39   : > { %s1975_s25 = sand.u32 1, %s3789_s1  }
 0xd3a   : > { %s1976_s0 = scalar_lea.sflag [#allocation4], %s1975_s25 }
 0xd3b   : > { %3017 = dma.done.wait (%p2416_p10), %s1976_s0, 128  }
 0xd3c   : > { %3019 = vsyncadd (%p2416_p10), %s1976_s0, 4294967168  ;;  %s3792_s30 = sld [smem:[#allocation34_spill]]  ;;  %s3795_s29 = smov %s3026_s2 }
 0xd3d   : > { %s3793_s18 = sld [smem:[#allocation33_spill]] }
 0xd3e   : > { %s3794_s6 = sld [smem:[#allocation35_spill]] }
 0xd42   : > { %p46_p6 = scmp.ge.s32.totalorder %s3792_s30, 4  }
 0xd43   : > { %s3796_s2 = smov %s3793_s18 }
 0xd44   :  { %48 = sbr.rel (!%p46_p6) target bundleno = 35 (0x23), region = 235 }
 0xd49   :  { %1982 = vsyncpa [#allocation3], 1 }
 0xd4a   :  { %1984 = vsyncpa [#allocation3 + $0x1], 1 }
 0xd4b   :  { %1985 = vsyncpa [#allocation6], 1 }
 0xd4c   :  { %1987 = vsyncpa [#allocation6 + $0x1], 1 }
 0xd4d   :  { %1988 = vsyncpa [#allocation9], 1 }
 0xd4e   :  { %1989 = vsyncpa [#allocation12], 1 }
 0xd4f   :  { %1990 = vsyncpa [#allocation15], 1 }
 0xd50   :  { %1991 = vsyncpa [#allocation18], 1 }
 0xd51   :  { %1992 = vsyncpa [#allocation21], 1 }
 0xd52   :  { %1993 = vsyncpa [#allocation4], 1 }
 0xd53   :  { %1995 = vsyncpa [#allocation4 + $0x1], 1 }

</bundles_post_ra>
